<compile_context>
chip_gen: v5e
topology: v5e:2x2
jax: 0.10.0
libtpu: 0.0.40
codegen_flags: <defaults>
</compile_context>

<pallas_src>
import functools

import jax
import jax.numpy as jnp
from jax import lax
from jax.experimental import pallas as pl
from jax.experimental.pallas import tpu as pltpu

# ---- `args` equivalents (small synthetic config) ----------------------------
USER = 16
ITEM = 16
N_NODES = USER + ITEM          # 32
MASK_DEPTH = 2                 # args.maskDepth
KEEP_RATE = 0.5                # args.keepRate

LANE = 128                     # vreg lane width


def _round_up(x, m):
    return -(-x // m) * m


def _mask_subgraph_kernel(adj_ref, seed_ref, samp_ref, unif_ref,
                          enc_ref, dec_ref, *, n_real, nnz, mask_depth):
    f32 = jnp.float32
    n_pad = adj_ref.shape[0]            # padded node count (multiple of 128)
    e_pad = unif_ref.shape[1]           # padded sample count (multiple of 128)

    A = adj_ref[...]                    # (Np, Np) binary f32, symmetric
    cur = seed_ref[...]                 # (Np, 1) {0,1} current seed set
    mask_col = cur                      # accumulated maskNodes indicator

    # ------------- seed BFS: remove incident edges, collect mask nodes -------
    # A (and hence A_rem / removed) is symmetric, so "row endpoint is a seed"
    # transposed gives "col endpoint is a seed" -- one XLU transpose per depth,
    # no column-vector relayouts, no matmuls.
    A_rem = A
    for depth in range(mask_depth):
        row_hit = A_rem * cur                       # edges whose row is a seed
        col_hit = jnp.transpose(row_hit)            # symmetry: col is a seed
        removed = jnp.maximum(row_hit, col_hit)     # binary
        A_rem = A_rem - removed
        if depth != mask_depth - 1:
            # endpoints of removed edges (removed is symmetric -> one reduce)
            nxt = (jnp.sum(removed, axis=1, keepdims=True) > 0.0).astype(f32)
            mask_col = jnp.maximum(mask_col, nxt)
            cur = nxt

    # ------------- encoderAdj: D^-1/2 * A_rem * D^-1/2 -----------------------
    deg = jnp.sum(A_rem, axis=1, keepdims=True) + 1e-12      # (Np, 1)
    d = lax.rsqrt(deg)                                       # degree ** -0.5
    # (A_rem * d)^T * d == A_rem[r,c] * d[r] * d[c]   (requires A_rem symmetric)
    enc = jnp.transpose(A_rem * d) * d
    enc_ref[...] = enc.astype(enc_ref.dtype)

    # ------------- decoderAdj ------------------------------------------------
    # maskNodes U sampedNodes
    mask_all = jnp.maximum(mask_col, samp_ref[...])          # (Np, 1)
    tem_num = jnp.sum(mask_all, keepdims=True)               # (1, 1) f32 exact
    tem_safe = jnp.maximum(tem_num, 1.0)                     # guard temNum == 0

    row_iota = lax.broadcasted_iota(jnp.int32, (n_pad, n_pad), 0)
    col_iota = lax.broadcasted_iota(jnp.int32, (n_pad, n_pad), 1)

    # exclusive rank of each node inside the maskNode set (ordered by node id),
    # computed with VPU compare + XLU transpose/reduce (no MXU, no strict_lower
    # constant fed to the MXU).
    mask_sq_t = jnp.transpose(jnp.broadcast_to(mask_all, (n_pad, n_pad)))
    rank_col = jnp.sum(jnp.where(col_iota < row_iota, mask_sq_t, 0.0),
                       axis=1, keepdims=True)                # (Np, 1)

    # temRows / temCols indices: floor(u * temNum), u in [0,1) lane-major.
    idx = jnp.floor(unif_ref[...] * tem_safe)                # (2, E_pad)
    idx = jnp.minimum(idx, tem_safe - 1.0)
    idx_r = idx[0:1, :]                                      # (1, E_pad)
    idx_c = idx[1:2, :]

    sample_iota = lax.broadcasted_iota(jnp.int32, (1, e_pad), 1)
    valid = sample_iota < nnz                                # only nnz real samples
    mask_b = mask_all > 0.0                                  # (Np, 1) bool

    # one-hots: nodes along sublanes, samples along lanes (lane-dense in E)
    oh_r = jnp.logical_and(jnp.logical_and(rank_col == idx_r, mask_b), valid)
    oh_c = jnp.logical_and(jnp.logical_and(rank_col == idx_c, mask_b), valid)
    oh_r16 = oh_r.astype(jnp.float32).astype(jnp.bfloat16)   # {0,1}: lossless
    oh_c16 = oh_c.astype(jnp.float32).astype(jnp.bfloat16)

    # pair[a, b] = #samples s with (temRows[s], temCols[s]) == (a, b)
    pair = lax.dot_general(oh_r16, oh_c16, (((1,), (1,)), ((), ())),
                           preferred_element_type=jnp.float32)   # (Np, Np)

    # hashVal dedup == binary OR of all edge sources; reverse direction is just
    # the transpose of `pair` (XLU), self loops via iota compare (real nodes).
    dec_b = (pair + jnp.transpose(pair) + A_rem) > 0.0
    dec_b = jnp.logical_or(
        dec_b, jnp.logical_and(row_iota == col_iota, row_iota < n_real))
    dec_ref[...] = dec_b.astype(dec_ref.dtype)


def random_mask_subgraphs(adj, seed_mask, samp_mask, uniforms, *, nnz,
                          mask_depth=MASK_DEPTH):
    """Dense RandomMaskSubgraphs forward.

    adj:       (N, N) f32 binary adjacency; MUST be symmetric (the kernel's
               transpose-based incidence / normalization relies on it).
    seed_mask: (N,) f32 {0,1} indicator of seed nodes.
    samp_mask: (N,) f32 {0,1} indicator of sampedNodes.
    uniforms:  (2, E) f32 in [0,1); row 0 -> temRows draws, row 1 -> temCols.
    nnz:       python int == number of nonzeros in adj (static; a different
               edge count triggers a recompile, like the torch shape).
    Returns (encoderAdj, decoderAdj) as dense (N, N) f32.
    """
    n = adj.shape[0]
    n_pad = _round_up(max(n, LANE), LANE)
    e = uniforms.shape[1]
    e_pad = _round_up(max(e, LANE), LANE)

    # Lane-dense padding done in the wrapper (nodes -> 128 multiple, samples
    # -> 128 multiple); padded rows/cols are all-zero and cannot affect results.
    adj_p = jnp.zeros((n_pad, n_pad), jnp.float32).at[:n, :n].set(
        adj.astype(jnp.float32))
    seed_p = jnp.zeros((n_pad, 1), jnp.float32).at[:n, 0].set(
        seed_mask.astype(jnp.float32))
    samp_p = jnp.zeros((n_pad, 1), jnp.float32).at[:n, 0].set(
        samp_mask.astype(jnp.float32))
    unif_p = jnp.zeros((2, e_pad), jnp.float32).at[:, :e].set(
        uniforms.astype(jnp.float32))

    kernel = functools.partial(_mask_subgraph_kernel, n_real=n, nnz=nnz,
                               mask_depth=mask_depth)

    # TODO(synk): single-block design is for small padded N; for large graphs
    # this must be tiled into row blocks with an E-chunk "arbitrary" reduction
    # axis accumulating `pair` in VMEM scratch (pl.when init/finalize) and
    # "parallel" row-block axes for megacore (v7x).
    enc, dec = pl.pallas_call(
        kernel,
        out_shape=(jax.ShapeDtypeStruct((n_pad, n_pad), jnp.float32),
                   jax.ShapeDtypeStruct((n_pad, n_pad), jnp.float32)),
        grid=(1,),
        in_specs=[pl.BlockSpec((n_pad, n_pad), lambda i: (0, 0)),
                  pl.BlockSpec((n_pad, 1), lambda i: (0, 0)),
                  pl.BlockSpec((n_pad, 1), lambda i: (0, 0)),
                  pl.BlockSpec((2, e_pad), lambda i: (0, 0))],
        out_specs=(pl.BlockSpec((n_pad, n_pad), lambda i: (0, 0)),
                   pl.BlockSpec((n_pad, n_pad), lambda i: (0, 0))),
        compiler_params=pltpu.CompilerParams(
            dimension_semantics=("arbitrary",),
            vmem_limit_bytes=32 * 1024 * 1024),
    )(adj_p, seed_p, samp_p, unif_p)
    return enc[:n, :n], dec[:n, :n]


if __name__ == "__main__":
    key = jax.random.PRNGKey(0)
    k_adj, k_samp, k_u = jax.random.split(key, 3)

    # Bipartite user-item interactions, symmetrized into a dense N x N adjacency.
    ui = (jax.random.uniform(k_adj, (USER, ITEM)) < 0.25).astype(jnp.float32)
    adj = jnp.zeros((N_NODES, N_NODES), jnp.float32)
    adj = adj.at[:USER, USER:].set(ui)
    adj = adj.at[USER:, :USER].set(ui.T)
    assert bool(jnp.all(adj == adj.T)), "adjacency must be symmetric"

    nnz = int(jnp.sum(adj))                      # == adj._values().shape[0]

    # seeds (node ids) -> (N,) indicator
    seeds = jnp.array([0, 3, USER + 2], jnp.int32)
    seed_mask = jnp.zeros((N_NODES,), jnp.float32).at[seeds].set(1.0)

    # sampedNodes = randint(N, size=[int(N * keepRate)]) -> (N,) indicator
    samp_num = int(N_NODES * KEEP_RATE)
    samped = jax.random.randint(k_samp, (samp_num,), 0, N_NODES)
    samp_mask = jnp.zeros((N_NODES,), jnp.float32).at[samped].set(1.0)

    # lane-major uniforms in [0,1): row 0 -> temRows draws, row 1 -> temCols
    uniforms = jax.random.uniform(k_u, (2, max(nnz, 1)), jnp.float32)

    # TODO(synk): the module's one-shot `print('MASKED INTERACTIONS', ...)` /
    # `self.flag` logging side effect is intentionally not reproduced.
    enc, dec = random_mask_subgraphs(adj, seed_mask, samp_mask, uniforms,
                                     nnz=nnz)
    jax.block_until_ready((enc, dec))
    print("KERNEL_OK")
</pallas_src>

<mosaic_0001>
module attributes {stable_mosaic.version = 11 : i64} {
  func.func @_mask_subgraph_kernel(%arg0: i32, %arg1: memref<128x128xf32, #tpu.memory_space<vmem>>, %arg2: memref<128x1xf32, #tpu.memory_space<vmem>>, %arg3: memref<128x1xf32, #tpu.memory_space<vmem>>, %arg4: memref<2x256xf32, #tpu.memory_space<vmem>>, %arg5: memref<128x128xf32, #tpu.memory_space<vmem>>, %arg6: memref<128x128xf32, #tpu.memory_space<vmem>>) attributes {dimension_semantics = [#tpu.dimension_semantics<arbitrary>], iteration_bounds = array<i64: 1>, scalar_prefetch = 0 : i64, scratch_operands = 0 : i64, tpu.core_type = #tpu.core_type<tc>, window_params = [{pipeline_mode = #tpu.pipeline_mode<synchronous>, transform_indices = @transform_0, window_bounds = array<i64: 128, 128>}, {pipeline_mode = #tpu.pipeline_mode<synchronous>, transform_indices = @transform_1, window_bounds = array<i64: 128, 1>}, {pipeline_mode = #tpu.pipeline_mode<synchronous>, transform_indices = @transform_2, window_bounds = array<i64: 128, 1>}, {pipeline_mode = #tpu.pipeline_mode<synchronous>, transform_indices = @transform_3, window_bounds = array<i64: 2, 256>}, {pipeline_mode = #tpu.pipeline_mode<synchronous>, transform_indices = @transform_4, window_bounds = array<i64: 128, 128>}, {pipeline_mode = #tpu.pipeline_mode<synchronous>, transform_indices = @transform_5, window_bounds = array<i64: 128, 128>}]} {
    %c0 = arith.constant 0 : index
    %c0_0 = arith.constant 0 : index
    %0 = vector.load %arg1[%c0, %c0_0] : memref<128x128xf32, #tpu.memory_space<vmem>>, vector<128x128xf32>
    %c0_1 = arith.constant 0 : index
    %c0_2 = arith.constant 0 : index
    %1 = vector.load %arg2[%c0_1, %c0_2] : memref<128x1xf32, #tpu.memory_space<vmem>>, vector<128x1xf32>
    %2 = vector.broadcast %1 : vector<128x1xf32> to vector<128x128xf32>
    %3 = arith.mulf %0, %2 : vector<128x128xf32>
    %4 = tpu.transpose %3, [1, 0] : vector<128x128xf32> -> vector<128x128xf32>
    %5 = arith.maximumf %3, %4 : vector<128x128xf32>
    %6 = arith.subf %0, %5 : vector<128x128xf32>
    %cst = arith.constant dense<0.000000e+00> : vector<128xf32>
    %7 = vector.multi_reduction <add>, %5, %cst [1] : vector<128x128xf32> to vector<128xf32>
    %8 = vector.shape_cast %7 : vector<128xf32> to vector<128x1xf32>
    %cst_3 = arith.constant 0.000000e+00 : f32
    %9 = vector.broadcast %cst_3 : f32 to vector<128x1xf32>
    %10 = arith.cmpf ogt, %8, %9 : vector<128x1xf32>
    %11 = arith.extui %10 : vector<128x1xi1> to vector<128x1xi32>
    %12 = arith.sitofp %11 : vector<128x1xi32> to vector<128x1xf32>
    %13 = arith.maximumf %1, %12 : vector<128x1xf32>
    %14 = vector.broadcast %12 : vector<128x1xf32> to vector<128x128xf32>
    %15 = arith.mulf %6, %14 : vector<128x128xf32>
    %16 = tpu.transpose %15, [1, 0] : vector<128x128xf32> -> vector<128x128xf32>
    %17 = arith.maximumf %15, %16 : vector<128x128xf32>
    %18 = arith.subf %6, %17 : vector<128x128xf32>
    %cst_4 = arith.constant dense<0.000000e+00> : vector<128xf32>
    %19 = vector.multi_reduction <add>, %18, %cst_4 [1] : vector<128x128xf32> to vector<128xf32>
    %20 = vector.shape_cast %19 : vector<128xf32> to vector<128x1xf32>
    %cst_5 = arith.constant 9.99999996E-13 : f32
    %21 = vector.broadcast %cst_5 : f32 to vector<128x1xf32>
    %22 = arith.addf %20, %21 : vector<128x1xf32>
    %23 = math.rsqrt %22 : vector<128x1xf32>
    %24 = vector.broadcast %23 : vector<128x1xf32> to vector<128x128xf32>
    %25 = arith.mulf %18, %24 : vector<128x128xf32>
    %26 = tpu.transpose %25, [1, 0] : vector<128x128xf32> -> vector<128x128xf32>
    %27 = vector.broadcast %23 : vector<128x1xf32> to vector<128x128xf32>
    %28 = arith.mulf %26, %27 : vector<128x128xf32>
    %c0_6 = arith.constant 0 : index
    %c0_7 = arith.constant 0 : index
    %29 = vector.load %arg5[%c0_6, %c0_7] : memref<128x128xf32, #tpu.memory_space<vmem>>, vector<128x128xf32>
    tpu.vector_store %arg5[%c0_6, %c0_7], %28 {strides = array<i32>} : memref<128x128xf32, #tpu.memory_space<vmem>>, vector<128x128xf32>,
    %c0_8 = arith.constant 0 : index
    %c0_9 = arith.constant 0 : index
    %30 = vector.load %arg3[%c0_8, %c0_9] : memref<128x1xf32, #tpu.memory_space<vmem>>, vector<128x1xf32>
    %31 = arith.maximumf %13, %30 : vector<128x1xf32>
    %32 = vector.shape_cast %31 : vector<128x1xf32> to vector<1x128x1xf32>
    %cst_10 = arith.constant dense<0.000000e+00> : vector<1xf32>
    %33 = vector.multi_reduction <add>, %32, %cst_10 [1, 2] : vector<1x128x1xf32> to vector<1xf32>
    %34 = vector.shape_cast %33 : vector<1xf32> to vector<1x1x1xf32>
    %35 = vector.extract %34[0, 0, 0] : f32 from vector<1x1x1xf32>
    %36 = vector.broadcast %35 : f32 to vector<1x1xf32>
    %cst_11 = arith.constant 1.000000e+00 : f32
    %37 = vector.broadcast %cst_11 : f32 to vector<1x1xf32>
    %38 = arith.maximumf %36, %37 : vector<1x1xf32>
    %39 = tpu.iota {dimensions = array<i32: 0>} : vector<128x128xi32>
    %40 = tpu.iota {dimensions = array<i32: 1>} : vector<128x128xi32>
    %41 = vector.shape_cast %31 : vector<128x1xf32> to vector<128x1xf32>
    %42 = vector.broadcast %41 : vector<128x1xf32> to vector<128x128xf32>
    %43 = tpu.transpose %42, [1, 0] : vector<128x128xf32> -> vector<128x128xf32>
    %44 = arith.cmpi slt, %40, %39 : vector<128x128xi32>
    %cst_12 = arith.constant 0.000000e+00 : f32
    %45 = vector.broadcast %cst_12 : f32 to vector<128x128xf32>
    %46 = arith.select %44, %43, %45 : vector<128x128xi1>, vector<128x128xf32>
    %cst_13 = arith.constant dense<0.000000e+00> : vector<128xf32>
    %47 = vector.multi_reduction <add>, %46, %cst_13 [1] : vector<128x128xf32> to vector<128xf32>
    %48 = vector.shape_cast %47 : vector<128xf32> to vector<128x1xf32>
    %c0_14 = arith.constant 0 : index
    %c0_15 = arith.constant 0 : index
    %49 = vector.load %arg4[%c0_14, %c0_15] : memref<2x256xf32, #tpu.memory_space<vmem>>, vector<2x256xf32>
    %50 = vector.broadcast %38 : vector<1x1xf32> to vector<2x256xf32>
    %51 = arith.mulf %49, %50 : vector<2x256xf32>
    %52 = math.floor %51 : vector<2x256xf32>
    %cst_16 = arith.constant 1.000000e+00 : f32
    %53 = vector.broadcast %cst_16 : f32 to vector<1x1xf32>
    %54 = arith.subf %38, %53 : vector<1x1xf32>
    %55 = vector.broadcast %54 : vector<1x1xf32> to vector<2x256xf32>
    %56 = arith.minimumf %52, %55 : vector<2x256xf32>
    %57 = vector.extract_strided_slice %56 {offsets = [0, 0], sizes = [1, 256], strides = [1, 1]} : vector<2x256xf32> to vector<1x256xf32>
    %58 = vector.extract_strided_slice %56 {offsets = [1, 0], sizes = [1, 256], strides = [1, 1]} : vector<2x256xf32> to vector<1x256xf32>
    %59 = tpu.iota {dimensions = array<i32: 1>} : vector<1x256xi32>
    %c148_i32 = arith.constant 148 : i32
    %60 = vector.broadcast %c148_i32 : i32 to vector<1x256xi32>
    %61 = arith.cmpi slt, %59, %60 : vector<1x256xi32>
    %cst_17 = arith.constant 0.000000e+00 : f32
    %62 = vector.broadcast %cst_17 : f32 to vector<128x1xf32>
    %63 = arith.cmpf ogt, %31, %62 : vector<128x1xf32>
    %64 = vector.broadcast %48 : vector<128x1xf32> to vector<128x256xf32>
    %65 = vector.broadcast %57 : vector<1x256xf32> to vector<128x256xf32>
    %66 = arith.cmpf oeq, %64, %65 : vector<128x256xf32>
    %67 = vector.broadcast %63 : vector<128x1xi1> to vector<128x256xi1>
    %68 = arith.andi %66, %67 : vector<128x256xi1>
    %69 = vector.broadcast %61 : vector<1x256xi1> to vector<128x256xi1>
    %70 = arith.andi %68, %69 : vector<128x256xi1>
    %71 = vector.broadcast %48 : vector<128x1xf32> to vector<128x256xf32>
    %72 = vector.broadcast %58 : vector<1x256xf32> to vector<128x256xf32>
    %73 = arith.cmpf oeq, %71, %72 : vector<128x256xf32>
    %74 = vector.broadcast %63 : vector<128x1xi1> to vector<128x256xi1>
    %75 = arith.andi %73, %74 : vector<128x256xi1>
    %76 = vector.broadcast %61 : vector<1x256xi1> to vector<128x256xi1>
    %77 = arith.andi %75, %76 : vector<128x256xi1>
    %78 = arith.extui %70 : vector<128x256xi1> to vector<128x256xi32>
    %79 = arith.sitofp %78 : vector<128x256xi32> to vector<128x256xf32>
    %80 = arith.truncf %79 : vector<128x256xf32> to vector<128x256xbf16>
    %81 = arith.extui %77 : vector<128x256xi1> to vector<128x256xi32>
    %82 = arith.sitofp %81 : vector<128x256xi32> to vector<128x256xf32>
    %83 = arith.truncf %82 : vector<128x256xf32> to vector<128x256xbf16>
    %cst_18 = arith.constant dense<0.000000e+00> : vector<128x128xf32>
    %84 = tpu.matmul %80, %83, %cst_18 {dimension_numbers = #tpu.dot_dimension_numbers<[1], [1], [0], [0], [0, 0, 1, 0], [], []>} : vector<128x256xbf16>, vector<128x256xbf16>, vector<128x128xf32> -> vector<128x128xf32>
    %85 = tpu.transpose %84, [1, 0] : vector<128x128xf32> -> vector<128x128xf32>
    %86 = arith.addf %84, %85 : vector<128x128xf32>
    %87 = arith.addf %86, %18 : vector<128x128xf32>
    %cst_19 = arith.constant 0.000000e+00 : f32
    %88 = vector.broadcast %cst_19 : f32 to vector<128x128xf32>
    %89 = arith.cmpf ogt, %87, %88 : vector<128x128xf32>
    %90 = arith.cmpi eq, %39, %40 : vector<128x128xi32>
    %c32_i32 = arith.constant 32 : i32
    %91 = vector.broadcast %c32_i32 : i32 to vector<128x128xi32>
    %92 = arith.cmpi slt, %39, %91 : vector<128x128xi32>
    %93 = arith.andi %90, %92 : vector<128x128xi1>
    %94 = arith.ori %89, %93 : vector<128x128xi1>
    %95 = arith.extui %94 : vector<128x128xi1> to vector<128x128xi32>
    %96 = arith.sitofp %95 : vector<128x128xi32> to vector<128x128xf32>
    %c0_20 = arith.constant 0 : index
    %c0_21 = arith.constant 0 : index
    %97 = vector.load %arg6[%c0_20, %c0_21] : memref<128x128xf32, #tpu.memory_space<vmem>>, vector<128x128xf32>
    tpu.vector_store %arg6[%c0_20, %c0_21], %96 {strides = array<i32>} : memref<128x128xf32, #tpu.memory_space<vmem>>, vector<128x128xf32>,
    return
  }
  func.func @transform_0(%arg0: i32) -> (i32, i32) {
    %c0_i32 = arith.constant 0 : i32
    %c0_i32_0 = arith.constant 0 : i32
    %c0_i32_1 = arith.constant 0 : i32
    return %c0_i32, %c0_i32_0 : i32, i32
  }
  func.func @transform_1(%arg0: i32) -> (i32, i32) {
    %c0_i32 = arith.constant 0 : i32
    %c0_i32_0 = arith.constant 0 : i32
    %c0_i32_1 = arith.constant 0 : i32
    return %c0_i32, %c0_i32_0 : i32, i32
  }
  func.func @transform_2(%arg0: i32) -> (i32, i32) {
    %c0_i32 = arith.constant 0 : i32
    %c0_i32_0 = arith.constant 0 : i32
    %c0_i32_1 = arith.constant 0 : i32
    return %c0_i32, %c0_i32_0 : i32, i32
  }
  func.func @transform_3(%arg0: i32) -> (i32, i32) {
    %c0_i32 = arith.constant 0 : i32
    %c0_i32_0 = arith.constant 0 : i32
    %c0_i32_1 = arith.constant 0 : i32
    return %c0_i32, %c0_i32_0 : i32, i32
  }
  func.func @transform_4(%arg0: i32) -> (i32, i32) {
    %c0_i32 = arith.constant 0 : i32
    %c0_i32_0 = arith.constant 0 : i32
    %c0_i32_1 = arith.constant 0 : i32
    return %c0_i32, %c0_i32_0 : i32, i32
  }
  func.func @transform_5(%arg0: i32) -> (i32, i32) {
    %c0_i32 = arith.constant 0 : i32
    %c0_i32_0 = arith.constant 0 : i32
    %c0_i32_1 = arith.constant 0 : i32
    return %c0_i32, %c0_i32_0 : i32, i32
  }
}

</mosaic_0001>

<bundles_post_ra>
// kernel: tpu_custom_call.1
= control target key start
LH: loop header
LB: loop body
LE: loop exit
PB: predicated region body
PF: predicated region fallthrough
CT: control target
= control target key end

     0   :  { %11 = vsyncpa [#allocation3], 0  ;;  %v4167_v2 = vmov 0   ;;  %s4160_s0 = inlined_call_operand.vmem [shape: f32[128,128], index: 0, kind: input, shape index: {}]   ;;  %s4161_s1 = inlined_call_operand.vmem [shape: f32[128,1], index: 1, kind: input, shape index: {}]   ;;  %s4162_s2 = inlined_call_operand.vmem [shape: f32[128,1], index: 2, kind: input, shape index: {}]   ;;  %s4163_s3 = inlined_call_operand.vmem [shape: f32[2,256], index: 3, kind: input, shape index: {}]   ;;  %s4164_s4 = inlined_call_operand.hbm [shape: f32[128,128], index: 4, kind: output, shape index: {0}]   ;;  %s4165_s5 = inlined_call_operand.hbm [shape: f32[128,128], index: 5, kind: output, shape index: {1}]  }
   0x1   :  { %v2059_v0 = vld [vmem:[%s4161_s1 + $0x10] sm:$0xff]  ;;  %v2064_v1 = vld [vmem:[%s4161_s1] sm:$0xff]  ;;  %1933 = vset.pattern.permute.xlu1 %v4167_v2  ;;  %1932 = vset.pattern.permute.xlu0 %v4167_v2 }
   0x2   :  { %65 = vperm.xlu1 %1933, %v2059_v0   ;;  %55 = vperm.xlu0 %1932, %v2064_v1   ;;  %v2073_v3 = vld [vmem:[%s4161_s1 + $0x20] sm:$0xff] }
   0x3   :  { %1934 = vset.pattern.permute.xlu2 %v4167_v2 }
   0x4   :  { %75 = vperm.xlu2 %1934, %v2073_v3  }
   0x5   :  { %12 = vsyncpa [#allocation5], 0  ;;  %v2080_v4 = vld [vmem:[%s4161_s1 + $0x18] sm:$0xff]  ;;  %v2085_v5 = vld [vmem:[%s4161_s1 + $0x8] sm:$0xff]  ;;  %vm709_vm2 = vcmask 7168   ;;  %s1716_s12 = sshll.u32 %s4164_s4, 4  ;;  %s1717_s12 = int_to_ptr.hbm [resolvable:$true] %s1716_s12 }
   0x6   :  { %v2090_v6 = vld [vmem:[%s4161_s1 + $0x28] sm:$0xff]  ;;  %v2098_v7 = vld [vmem:[%s4161_s1 + $0x38] sm:$0xff]  ;;  %v2103_v8 = vld [vmem:[%s4161_s1 + $0x30] sm:$0xff]  ;;  %s2022_s13 = smov [#allocation2]   ;;  %s2023_s15 = smov 128  }
   0x7   :  { %v2108_v9 = vld [vmem:[%s4161_s1 + $0x40] sm:$0xff]  ;;  %v2116_v10 = vld [vmem:[%s4161_s1 + $0x50] sm:$0xff]  ;;  %v2121_v11 = vld [vmem:[%s4161_s1 + $0x48] sm:$0xff]  ;;  %s1714_s14 = sshll.u32 %s2022_s13, 4  ;;  %s2024_s16 = smov 8   ;;  %s1715_s14 = int_to_ptr.vmem [resolvable:$true] %s1714_s14 }
   0x8   :  { %v2126_v12 = vld [vmem:[%s4161_s1 + $0x58] sm:$0xff]  ;;  %v2134_v13 = vld [vmem:[%s4161_s1 + $0x68] sm:$0xff]  ;;  %v2139_v14 = vld [vmem:[%s4161_s1 + $0x60] sm:$0xff]  ;;  %s2025_s4 = smov [#allocation4]   ;;  %s1729_s20 = sshll.u32 %s4165_s5, 4  ;;  %s1730_s20 = int_to_ptr.hbm [resolvable:$true] %s1729_s20 }
   0x9   :  { %v2144_v15 = vld [vmem:[%s4161_s1 + $0x70] sm:$0xff]  ;;  %v2152_v16 = vld [vmem:[%s4161_s1 + $0x78] sm:$0xff]  ;;  %v2158_v17 = vld [vmem:[%s4160_s0] sm:$0xff]  ;;  %s1727_s17 = sshll.u32 %s2025_s4, 4  ;;  %s1728_s17 = int_to_ptr.vmem [resolvable:$true] %s1727_s17 }
   0xa   :  { %70 = vperm.xlu1 %1933, %v2080_v4   ;;  %60 = vperm.xlu0 %1932, %v2085_v5   ;;  %v2167_v20 = vld [vmem:[%s4160_s0 + $0x8] sm:$0xff]  ;;  %v2173_v23 = vld [vmem:[%s4160_s0 + $0x10] sm:$0xff]  ;;  %v2179_v26 = vld [vmem:[%s4160_s0 + $0x18] sm:$0xff] }
   0xb   :  { %v2185_v29 = vld [vmem:[%s4160_s0 + $0x20] sm:$0xff]  ;;  %v2191_v32 = vld [vmem:[%s4160_s0 + $0x28] sm:$0xff]  ;;  %v2197_v36 = vld [vmem:[%s4160_s0 + $0x30] sm:$0xff] }
   0xc   :  { %80 = vperm.xlu2 %1934, %v2090_v6   ;;  %v2203_v39 = vld [vmem:[%s4160_s0 + $0x38] sm:$0xff]  ;;  %v2209_v41 = vld [vmem:[%s4160_s0 + $0x40] sm:$0xff]  ;;  %v2215_v45 = vld [vmem:[%s4160_s0 + $0x48] sm:$0xff] }
   0xd   :  { %v2221_v48 = vld [vmem:[%s4160_s0 + $0x50] sm:$0xff]  ;;  %v2227_v50 = vld [vmem:[%s4160_s0 + $0x58] sm:$0xff]  ;;  %v2233_v54 = vld [vmem:[%s4160_s0 + $0x60] sm:$0xff] }
   0xe   :  { %v2239_v57 = vld [vmem:[%s4160_s0 + $0x68] sm:$0xff]  ;;  %v2245_v60 = vld [vmem:[%s4160_s0 + $0x70] sm:$0xff]  ;;  %v2251_v63 = vld [vmem:[%s4160_s0 + $0x78] sm:$0xff] }
   0xf   :  { %4280 = vst [vmem:[#allocation8_spill] sm:$0xff] %v2251_v63 }
  0x12   :  { %90 = vperm.xlu1 %1933, %v2098_v7   ;;  %85 = vperm.xlu0 %1932, %v2103_v8  }
  0x14   :  { %95 = vperm.xlu2 %1934, %v2108_v9  }
  0x1a   :  { %105 = vperm.xlu1 %1933, %v2116_v10   ;;  %100 = vperm.xlu0 %1932, %v2121_v11  }
  0x1c   :  { %110 = vperm.xlu2 %1934, %v2126_v12  }
  0x22   :  { %120 = vperm.xlu1 %1933, %v2134_v13   ;;  %115 = vperm.xlu0 %1932, %v2139_v14  }
  0x24   :  { %125 = vperm.xlu2 %1934, %v2144_v15  }
  0x2a   :  { %130 = vperm.xlu0 %1932, %v2152_v16  }
  0x5e   :  { %v76_v30 = vpop.permute.xlu2 %75 }
  0x5f   :  { %v137_v31 = vmul.f32 %v76_v30, %v2185_v29 }
  0x66   :  { %v81_v33 = vpop.permute.xlu2 %80 }
  0x67   :  { %v138_v34 = vmul.f32 %v81_v33, %v2191_v32 }
  0x6e   :  { %v96_v42 = vpop.permute.xlu2 %95 }
  0x6f   :  { %v141_v43 = vmul.f32 %v96_v42, %v2209_v41 }
  0x74   :  { %v56_v18 = vpop.permute.xlu0 %55  ;;  %v66_v24 = vpop.permute.xlu1 %65 }
  0x75   :  { %v2161_v19 = vmul.f32 %v56_v18, %v2158_v17  ;;  %v135_v25 = vmul.f32 %v66_v24, %v2173_v23 }
  0x76   :  { %v111_v51 = vpop.permute.xlu2 %110 }
  0x77   :  { %149 = vxpose.xlu1.b32.start [1/16] %v2161_v19, 128  ;;  %v144_v52 = vmul.f32 %v111_v51, %v2227_v50 }
  0x7c   :  { %v61_v21 = vpop.permute.xlu0 %60  ;;  %v71_v27 = vpop.permute.xlu1 %70 }
  0x7d   :  { %v134_v22 = vmul.f32 %v61_v21, %v2167_v20  ;;  %v136_v28 = vmul.f32 %v71_v27, %v2179_v26 }
  0x7e   :  { %v126_v59 = vpop.permute.xlu2 %125 }
  0x7f   :  { %150 = vxpose.xlu1.b32.cont [2/16] %v134_v22, 128  ;;  %v147_v61 = vmul.f32 %v126_v59, %v2245_v60 }
  0x84   :  { %v86_v35 = vpop.permute.xlu0 %85  ;;  %v91_v38 = vpop.permute.xlu1 %90 }
  0x85   :  { %v139_v37 = vmul.f32 %v86_v35, %v2197_v36  ;;  %v140_v40 = vmul.f32 %v91_v38, %v2203_v39 }
  0x87   :  { %151 = vxpose.xlu1.b32.cont [3/16] %v135_v25, 128 }
  0x8c   :  { %v101_v44 = vpop.permute.xlu0 %100  ;;  %v106_v47 = vpop.permute.xlu1 %105 }
  0x8d   :  { %v142_v46 = vmul.f32 %v101_v44, %v2215_v45  ;;  %v143_v49 = vmul.f32 %v106_v47, %v2221_v48 }
  0x8f   :  { %152 = vxpose.xlu1.b32.cont [4/16] %v136_v28, 128 }
  0x94   :  { %v116_v53 = vpop.permute.xlu0 %115  ;;  %v121_v56 = vpop.permute.xlu1 %120 }
  0x95   :  { %v145_v55 = vmul.f32 %v116_v53, %v2233_v54  ;;  %v146_v58 = vmul.f32 %v121_v56, %v2239_v57 }
  0x97   :  { %153 = vxpose.xlu1.b32.cont [5/16] %v137_v31, 128 }
  0x9c   :  { %v131_v62 = vpop.permute.xlu0 %130 }
  0x9d   :  { %v148_v18 = vmul.f32 %v131_v62, %v2251_v63 }
  0x9f   :  { %154 = vxpose.xlu1.b32.cont [6/16] %v138_v34, 128 }
  0xa7   :  { %155 = vxpose.xlu1.b32.cont [7/16] %v139_v37, 128 }
  0xaf   :  { %156 = vxpose.xlu1.b32.cont [8/16] %v140_v40, 128 }
  0xb7   :  { %157 = vxpose.xlu1.b32.cont [9/16] %v141_v43, 128 }
  0xbf   :  { %158 = vxpose.xlu1.b32.cont [10/16] %v142_v46, 128 }
  0xc7   :  { %159 = vxpose.xlu1.b32.cont [11/16] %v143_v49, 128 }
  0xcf   :  { %160 = vxpose.xlu1.b32.cont [12/16] %v144_v52, 128 }
  0xd7   :  { %161 = vxpose.xlu1.b32.cont [13/16] %v145_v55, 128 }
  0xdf   :  { %162 = vxpose.xlu1.b32.cont [14/16] %v146_v58, 128 }
  0xe7   :  { %163 = vxpose.xlu1.b32.cont [15/16] %v147_v61, 128 }
  0xef   :  { %164 = vxpose.xlu1.b32.end [16/16] %v148_v18, 128 }
 0x11b   :  { %v165_v21 = vpop.trf.xlu1 }
 0x11c   :  { %v2255_v24 = vmax.f32 %v2161_v19, %v165_v21 }
 0x11e   :  { %213 = vadd.xlane.f32.xlu2 %v2255_v24 }
 0x123   :  { %v166_v27 = vpop.trf.xlu1 }
 0x124   :  { %v2258_v30 = vmax.f32 %v134_v22, %v166_v27 }
 0x126   :  { %215 = vadd.xlane.f32.xlu0 %v2258_v30 }
 0x12b   :  { %v167_v33 = vpop.trf.xlu1 }
 0x12c   :  { %v2261_v35 = vmax.f32 %v135_v25, %v167_v33 }
 0x12e   :  { %217 = vadd.xlane.f32.xlu2 %v2261_v35 }
 0x133   :  { %v168_v38 = vpop.trf.xlu1 }
 0x134   :  { %v2264_v42 = vmax.f32 %v136_v28, %v168_v38 }
 0x136   :  { %219 = vadd.xlane.f32.xlu2 %v2264_v42 }
 0x13b   :  { %v169_v44 = vpop.trf.xlu1 }
 0x13c   :  { %v2267_v19 = vmax.f32 %v137_v31, %v169_v44 }
 0x13e   :  { %221 = vadd.xlane.f32.xlu0 %v2267_v19 }
 0x143   :  { %v170_v47 = vpop.trf.xlu1 }
 0x144   :  { %v2270_v22 = vmax.f32 %v138_v34, %v170_v47 }
 0x146   :  { %223 = vadd.xlane.f32.xlu2 %v2270_v22 }
 0x14b   :  { %v171_v51 = vpop.trf.xlu1 }
 0x14c   :  { %v2273_v25 = vmax.f32 %v139_v37, %v171_v51  ;;  %v4174_v51 = vmov 0.0  }
 0x14e   :  { %225 = vadd.xlane.f32.xlu0 %v2273_v25 }
 0x153   :  { %v172_v53 = vpop.trf.xlu1 }
 0x154   :  { %v2276_v28 = vmax.f32 %v140_v40, %v172_v53 }
 0x156   :  { %227 = vadd.xlane.f32.xlu2 %v2276_v28 }
 0x15b   :  { %v173_v56 = vpop.trf.xlu1 }
 0x15c   :  { %v2279_v31 = vmax.f32 %v141_v43, %v173_v56 }
 0x15e   :  { %229 = vadd.xlane.f32.xlu0 %v2279_v31 }
 0x163   :  { %v174_v59 = vpop.trf.xlu1 }
 0x164   :  { %v2282_v34 = vmax.f32 %v142_v46, %v174_v59 }
 0x166   :  { %231 = vadd.xlane.f32.xlu2 %v2282_v34 }
 0x16b   :  { %v175_v62 = vpop.trf.xlu1 }
 0x16c   :  { %v2285_v37 = vmax.f32 %v143_v49, %v175_v62 }
 0x16e   :  { %233 = vadd.xlane.f32.xlu0 %v2285_v37 }
 0x173   :  { %v176_v21 = vpop.trf.xlu1 }
 0x174   :  { %v2288_v40 = vmax.f32 %v144_v52, %v176_v21 }
 0x176   :  { %235 = vadd.xlane.f32.xlu2 %v2288_v40 }
 0x17b   :  { %v177_v27 = vpop.trf.xlu1 }
 0x17c   :  { %v2291_v43 = vmax.f32 %v145_v55, %v177_v27 }
 0x17e   :  { %237 = vadd.xlane.f32.xlu0 %v2291_v43 }
 0x183   :  { %v178_v33 = vpop.trf.xlu1 }
 0x184   :  { %v2294_v46 = vmax.f32 %v146_v58, %v178_v33 }
 0x186   :  { %239 = vadd.xlane.f32.xlu2 %v2294_v46 }
 0x18b   :  { %v179_v38 = vpop.trf.xlu1 }
 0x18c   :  { %v2297_v49 = vmax.f32 %v147_v61, %v179_v38  ;;  %v677_v61 = vld [vmem:[%s4162_s2] sm:$0xff] }
 0x18e   :  { %241 = vadd.xlane.f32.xlu0 %v2297_v49 }
 0x191   :  { %v214_v44 = vpop.xlane.xlu2 %213 }
 0x192   :  { %vm245_vm0 = vcmp.gt.f32.partialorder %v214_v44, 0.0 }
 0x193   :  { %v180_v52 = vpop.trf.xlu1  ;;  %v2303_v55 = vsel %vm245_vm0, 1.0, %v4174_v51 }
 0x194   :  { %v2300_v47 = vmax.f32 %v148_v18, %v180_v52  ;;  %v293_v58 = vmax.f32 %v2064_v1, %v2303_v55  ;;  %v678_v18 = vld [vmem:[%s4162_s2 + $0x8] sm:$0xff] }
 0x196   :  { %243 = vadd.xlane.f32.xlu2 %v2300_v47  ;;  %v2319_v62 = vmax.f32 %v293_v58, %v677_v61 }
 0x198   :  { %4281 = vst [vmem:[#allocation9_spill] sm:$0xff] %v2319_v62  ;;  %v710_v27 = vsel %vm709_vm2, %v2319_v62, 0.0 }
 0x199   :  { %v216_v53 = vpop.xlane.xlu0 %215 }
 0x19a   :  { %vm246_vm1 = vcmp.gt.f32.partialorder %v216_v53, 0.0 }
 0x19b   :  { %v2312_v56 = vsel %vm246_vm1, 1.0, %v4174_v51 }
 0x19c   :  { %v294_v59 = vmax.f32 %v2085_v5, %v2312_v56  ;;  %v679_v5 = vld [vmem:[%s4162_s2 + $0x10] sm:$0xff] }
 0x19e   :  { %v2321_v1 = vmax.f32 %v294_v59, %v678_v18 }
 0x1a0   :  { %4282 = vst [vmem:[#allocation10_spill] sm:$0xff] %v2321_v1  ;;  %778 = vperm.xlu1 %1933, %v2321_v1   ;;  %v711_v21 = vsel %vm709_vm2, %v2321_v1, 0.0  ;;  %v682_v1 = vld [vmem:[%s4162_s2 + $0x28] sm:$0xff] }
 0x1a1   :  { %v218_v33 = vpop.xlane.xlu2 %217  ;;  %v712_v38 = vadd.f32 %v711_v21, %v710_v27  ;;  %v680_v21 = vld [vmem:[%s4162_s2 + $0x18] sm:$0xff] }
 0x1a2   :  { %vm247_vm3 = vcmp.gt.f32.partialorder %v218_v33, 0.0 }
 0x1a3   :  { %v2329_v44 = vsel %vm247_vm3, 1.0, %v4174_v51 }
 0x1a4   :  { %v295_v52 = vmax.f32 %v2059_v0, %v2329_v44 }
 0x1a6   :  { %v2336_v58 = vmax.f32 %v295_v52, %v679_v5  ;;  %v681_v52 = vld [vmem:[%s4162_s2 + $0x20] sm:$0xff] }
 0x1a8   :  { %4283 = vst [vmem:[#allocation11_spill] sm:$0xff] %v2336_v58  ;;  %v713_v53 = vsel %vm709_vm2, %v2336_v58, 0.0 }
 0x1a9   :  { %v220_v61 = vpop.xlane.xlu2 %219  ;;  %v714_v18 = vadd.f32 %v713_v53, %v712_v38 }
 0x1aa   :  { %vm248_vm4 = vcmp.gt.f32.partialorder %v220_v61, 0.0 }
 0x1ab   :  { %v2341_v59 = vsel %vm248_vm4, 1.0, %v4174_v51 }
 0x1ac   :  { %v296_v27 = vmax.f32 %v2080_v4, %v2341_v59 }
 0x1ae   :  { %773 = vperm.xlu2 %1934, %v2319_v62   ;;  %v2349_v0 = vmax.f32 %v296_v27, %v680_v21 }
 0x1b0   :  { %4284 = vst [vmem:[#allocation12_spill] sm:$0xff] %v2349_v0  ;;  %v715_v33 = vsel %vm709_vm2, %v2349_v0, 0.0 }
 0x1b1   :  { %v222_v5 = vpop.xlane.xlu0 %221  ;;  %v716_v38 = vadd.f32 %v715_v33, %v714_v18 }
 0x1b2   :  { %vm249_vm5 = vcmp.gt.f32.partialorder %v222_v5, 0.0 }
 0x1b3   :  { %v2357_v53 = vsel %vm249_vm5, 1.0, %v4174_v51 }
 0x1b4   :  { %v297_v4 = vmax.f32 %v2073_v3, %v2357_v53 }
 0x1b6   :  { %v697_v61 = vmax.f32 %v297_v4, %v681_v52  ;;  %783 = vperm.xlu2 %1934, %v2336_v58  }
 0x1b8   :  { %v717_v21 = vsel %vm709_vm2, %v697_v61, 0.0  ;;  %vm959_vm6 = vcmp.gt.f32.partialorder %v697_v61, 0.0 }
 0x1b9   :  { %v224_v27 = vpop.xlane.xlu2 %223  ;;  %v1014_v18 = vsel %vm959_vm6, 1, %v4167_v2  ;;  %v718_v33 = vadd.f32 %v717_v21, %v716_v38 }
 0x1ba   :  { %vm250_vm7 = vcmp.gt.f32.partialorder %v224_v27, 0.0  ;;  %1039 = vperm.xlu0 %1932, %v1014_v18   ;;  %v683_v18 = vld [vmem:[%s4162_s2 + $0x30] sm:$0xff] }
 0x1bb   :  { %v2365_v5 = vsel %vm250_vm7, 1.0, %v4174_v51 }
 0x1bc   :  { %v298_v3 = vmax.f32 %v2090_v6, %v2365_v5 }
 0x1be   :  { %788 = vperm.xlu2 %1934, %v2349_v0   ;;  %v2373_v52 = vmax.f32 %v298_v3, %v682_v1 }
 0x1c0   :  { %4285 = vst [vmem:[#allocation13_spill] sm:$0xff] %v2373_v52  ;;  %v719_v4 = vsel %vm709_vm2, %v2373_v52, 0.0 }
 0x1c1   :  { %v226_v38 = vpop.xlane.xlu0 %225  ;;  %v720_v21 = vadd.f32 %v719_v4, %v718_v33  ;;  %v684_v33 = vld [vmem:[%s4162_s2 + $0x38] sm:$0xff] }
 0x1c2   :  { %vm251_vm8 = vcmp.gt.f32.partialorder %v226_v38, 0.0 }
 0x1c3   :  { %v2378_v27 = vsel %vm251_vm8, 1.0, %v4174_v51 }
 0x1c4   :  { %v299_v6 = vmax.f32 %v2103_v8, %v2378_v27 }
 0x1c6   :  { %793 = vperm.xlu2 %1934, %v697_v61   ;;  %v699_v2 = vmax.f32 %v299_v6, %v683_v18  ;;  %v4286_v18 = vmov 0  }
 0x1c8   :  { %v721_v1 = vsel %vm709_vm2, %v699_v2, 0.0  ;;  %vm961_vm14 = vcmp.gt.f32.partialorder %v699_v2, 0.0 }
 0x1c9   :  { %v228_v3 = vpop.xlane.xlu2 %227  ;;  %v722_v0 = vadd.f32 %v721_v1, %v720_v21  ;;  %v685_v1 = vld [vmem:[%s4162_s2 + $0x40] sm:$0xff] }
 0x1ca   :  { %vm252_vm9 = vcmp.gt.f32.partialorder %v228_v3, 0.0 }
 0x1cb   :  { %v2390_v4 = vsel %vm252_vm9, 1.0, %v4174_v51 }
 0x1cc   :  { %v300_v38 = vmax.f32 %v2098_v7, %v2390_v4 }
 0x1ce   :  { %v700_v62 = vmax.f32 %v300_v38, %v684_v33  ;;  %798 = vperm.xlu2 %1934, %v2373_v52  }
 0x1d0   :  { %v723_v8 = vsel %vm709_vm2, %v700_v62, 0.0  ;;  %vm962_vm10 = vcmp.gt.f32.partialorder %v700_v62, 0.0 }
 0x1d1   :  { %v230_v61 = vpop.xlane.xlu0 %229  ;;  %v1017_v21 = vsel %vm962_vm10, 1, %v4286_v18  ;;  %v724_v6 = vadd.f32 %v723_v8, %v722_v0 }
 0x1d2   :  { %vm253_vm11 = vcmp.gt.f32.partialorder %v230_v61, 0.0  ;;  %1048 = vperm.xlu1 %1933, %v1017_v21   ;;  %v686_v21 = vld [vmem:[%s4162_s2 + $0x48] sm:$0xff] }
 0x1d3   :  { %v2401_v3 = vsel %vm253_vm11, 1.0, %v4174_v51 }
 0x1d4   :  { %v301_v7 = vmax.f32 %v2108_v9, %v2401_v3 }
 0x1d6   :  { %v701_v33 = vmax.f32 %v301_v7, %v685_v1  ;;  %803 = vperm.xlu2 %1934, %v699_v2   ;;  %v1016_v1 = vsel %vm961_vm14, 1, %v4286_v18  ;;  %v687_v2 = vld [vmem:[%s4162_s2 + $0x50] sm:$0xff] }
 0x1d8   :  { %v725_v38 = vsel %vm709_vm2, %v701_v33, 0.0  ;;  %vm963_vm12 = vcmp.gt.f32.partialorder %v701_v33, 0.0 }
 0x1d9   :  { %v232_v52 = vpop.xlane.xlu2 %231  ;;  %v1018_v0 = vsel %vm963_vm12, 1, %v4286_v18  ;;  %v726_v8 = vadd.f32 %v725_v38, %v724_v6 }
 0x1da   :  { %vm254_vm13 = vcmp.gt.f32.partialorder %v232_v52, 0.0  ;;  %1051 = vperm.xlu0 %1932, %v1018_v0  }
 0x1db   :  { %v2408_v61 = vsel %vm254_vm13, 1.0, %v4174_v51 }
 0x1dc   :  { %v302_v9 = vmax.f32 %v2121_v11, %v2408_v61 }
 0x1de   :  { %1045 = vperm.xlu2 %1934, %v1016_v1   ;;  %v702_v7 = vmax.f32 %v302_v9, %v686_v21 }
 0x1e0   :  { %v727_v58 = vsel %vm709_vm2, %v702_v7, 0.0  ;;  %vm964_vm5 = vcmp.gt.f32.partialorder %v702_v7, 0.0 }
 0x1e1   :  { %v234_v6 = vpop.xlane.xlu0 %233  ;;  %v728_v52 = vadd.f32 %v727_v58, %v726_v8 }
 0x1e2   :  { %vm255_vm15 = vcmp.gt.f32.partialorder %v234_v6, 0.0  ;;  %v688_v6 = vld [vmem:[%s4162_s2 + $0x58] sm:$0xff] }
 0x1e3   :  { %v2421_v38 = vsel %vm255_vm15, 1.0, %v4174_v51 }
 0x1e4   :  { %v303_v0 = vmax.f32 %v2116_v10, %v2421_v38 }
 0x1e6   :  { %v703_v11 = vmax.f32 %v303_v0, %v687_v2  ;;  %808 = vperm.xlu2 %1934, %v700_v62  }
 0x1e8   :  { %v729_v1 = vsel %vm709_vm2, %v703_v11, 0.0  ;;  %vm965_vm0 = vcmp.gt.f32.partialorder %v703_v11, 0.0 }
 0x1e9   :  { %v236_v21 = vpop.xlane.xlu2 %235  ;;  %v1020_v9 = vsel %vm965_vm0, 1, %v4286_v18  ;;  %v730_v58 = vadd.f32 %v729_v1, %v728_v52  ;;  %v689_v1 = vld [vmem:[%s4162_s2 + $0x60] sm:$0xff] }
 0x1ea   :  { %vm256_vm1 = vcmp.gt.f32.partialorder %v236_v21, 0.0  ;;  %1057 = vperm.xlu1 %1933, %v1020_v9  }
 0x1eb   :  { %v2428_v8 = vsel %vm256_vm1, 1.0, %v4174_v51 }
 0x1ec   :  { %v304_v10 = vmax.f32 %v2126_v12, %v2428_v8 }
 0x1ee   :  { %813 = vperm.xlu2 %1934, %v701_v33   ;;  %v704_v62 = vmax.f32 %v304_v10, %v688_v6  ;;  %v690_v10 = vld [vmem:[%s4162_s2 + $0x68] sm:$0xff] }
 0x1f0   :  { %v731_v2 = vsel %vm709_vm2, %v704_v62, 0.0  ;;  %vm966_vm9 = vcmp.gt.f32.partialorder %v704_v62, 0.0 }
 0x1f1   :  { %v238_v0 = vpop.xlane.xlu0 %237  ;;  %v732_v63 = vadd.f32 %v731_v2, %v730_v58 }
 0x1f2   :  { %vm257_vm3 = vcmp.gt.f32.partialorder %v238_v0, 0.0 }
 0x1f3   :  { %v2437_v52 = vsel %vm257_vm3, 1.0, %v4174_v51 }
 0x1f4   :  { %v305_v21 = vmax.f32 %v2139_v14, %v2437_v52  ;;  %v1019_v14 = vsel %vm964_vm5, 1, %v4286_v18 }
 0x1f6   :  { %818 = vperm.xlu2 %1934, %v702_v7   ;;  %v705_v9 = vmax.f32 %v305_v21, %v689_v1 }
 0x1f8   :  { %833 = vperm.xlu0 %1932, %v705_v9   ;;  %v733_v12 = vsel %vm709_vm2, %v705_v9, 0.0  ;;  %vm967_vm10 = vcmp.gt.f32.partialorder %v705_v9, 0.0 }
 0x1f9   :  { %v240_v33 = vpop.xlane.xlu2 %239  ;;  %v734_v6 = vadd.f32 %v733_v12, %v732_v63 }
 0x1fa   :  { %vm258_vm4 = vcmp.gt.f32.partialorder %v240_v33, 0.0  ;;  %v691_v33 = vld [vmem:[%s4162_s2 + $0x70] sm:$0xff] }
 0x1fb   :  { %v2446_v58 = vsel %vm258_vm4, 1.0, %v4174_v51 }
 0x1fc   :  { %v306_v2 = vmax.f32 %v2134_v13, %v2446_v58 }
 0x1fe   :  { %1054 = vperm.xlu2 %1934, %v1019_v14   ;;  %v706_v0 = vmax.f32 %v306_v2, %v690_v10 }
 0x200   :  { %838 = vperm.xlu1 %1933, %v706_v0   ;;  %vm968_vm6 = vcmp.gt.f32.partialorder %v706_v0, 0.0  ;;  %v735_v63 = vsel %vm709_vm2, %v706_v0, 0.0 }
 0x201   :  { %v242_v1 = vpop.xlane.xlu0 %241  ;;  %v1023_v7 = vsel %vm968_vm6, 1, %v4286_v18  ;;  %v736_v21 = vadd.f32 %v735_v63, %v734_v6  ;;  %v692_v6 = vld [vmem:[%s4162_s2 + $0x78] sm:$0xff] }
 0x202   :  { %vm259_vm7 = vcmp.gt.f32.partialorder %v242_v1, 0.0  ;;  %1066 = vperm.xlu0 %1932, %v1023_v7  }
 0x203   :  { %v2457_v12 = vsel %vm259_vm7, 1.0, %v4174_v51 }
 0x204   :  { %v307_v13 = vmax.f32 %v2144_v15, %v2457_v12 }
 0x206   :  { %823 = vperm.xlu2 %1934, %v703_v11   ;;  %v707_v10 = vmax.f32 %v307_v13, %v691_v33  ;;  %v1021_v13 = vsel %vm966_vm9, 1, %v4286_v18  ;;  %v1022_v33 = vsel %vm967_vm10, 1, %v4286_v18 }
 0x208   :  { %v737_v15 = vsel %vm709_vm2, %v707_v10, 0.0 }
 0x209   :  { %v244_v2 = vpop.xlane.xlu2 %243  ;;  %v738_v1 = vadd.f32 %v737_v15, %v736_v21 }
 0x20a   :  { %vm260_vm8 = vcmp.gt.f32.partialorder %v244_v2, 0.0 }
 0x20b   :  { %v2465_v14 = vsel %vm260_vm8, 1.0, %v4174_v51 }
 0x20c   :  { %v308_v0 = vmax.f32 %v2152_v16, %v2465_v14  ;;  %v2478_v16 = vsub.f32 %v2158_v17, %v2255_v24  ;;  %v2497_v24 = vsub.f32 %v2173_v23, %v2261_v35  ;;  %v2516_v35 = vsub.f32 %v2185_v29, %v2267_v19 }
 0x20d   :  { %v2534_v29 = vsub.f32 %v2197_v36, %v2273_v25  ;;  %v2554_v36 = vsub.f32 %v2209_v41, %v2279_v31  ;;  %v2572_v31 = vsub.f32 %v2221_v48, %v2285_v37  ;;  %v2590_v48 = vsub.f32 %v2233_v54, %v2291_v43 }
 0x20e   :  { %828 = vperm.xlu2 %1934, %v704_v62   ;;  %v708_v63 = vmax.f32 %v308_v0, %v692_v6  ;;  %v2482_v21 = vmul.f32 %v2303_v55, %v2478_v16  ;;  %v2487_v62 = vsub.f32 %v2167_v20, %v2258_v30  ;;  %v2501_v55 = vmul.f32 %v2329_v44, %v2497_v24 }
 0x20f   :  { %v2520_v44 = vmul.f32 %v2357_v53, %v2516_v35  ;;  %v2538_v53 = vmul.f32 %v2378_v27, %v2534_v29  ;;  %v2558_v25 = vmul.f32 %v2401_v3, %v2554_v36  ;;  %v2594_v37 = vmul.f32 %v2437_v52, %v2590_v48 }
 0x210   :  { %848 = vperm.xlu1 %1933, %v708_v63   ;;  %v739_v11 = vsel %vm709_vm2, %v708_v63, 0.0  ;;  %v2491_v6 = vmul.f32 %v2312_v56, %v2487_v62  ;;  %vm969_vm2 = vcmp.gt.f32.partialorder %v707_v10, 0.0  ;;  %vm970_vm11 = vcmp.gt.f32.partialorder %v708_v63, 0.0 }
 0x211   :  { %v740_v7 = vadd.f32 %v739_v11, %v738_v1  ;;  %v774_v2 = vpop.permute.xlu2 %773  ;;  %v1024_v17 = vsel %vm969_vm2, 1, %v4286_v18  ;;  %v1025_v30 = vsel %vm970_vm11, 1, %v4286_v18  ;;  %v2507_v56 = vsub.f32 %v2179_v26, %v2264_v42 }
 0x212   :  { %v2525_v42 = vsub.f32 %v2191_v32, %v2270_v22  ;;  %v779_v0 = vpop.permute.xlu1 %778  ;;  %v2543_v32 = vsub.f32 %v2203_v39, %v2276_v28  ;;  %v2563_v28 = vsub.f32 %v2215_v45, %v2282_v34  ;;  %v2581_v45 = vsub.f32 %v2227_v50, %v2288_v40 }
 0x213   :  { %v2601_v50 = vsub.f32 %v2239_v57, %v2294_v46  ;;  %v2610_v54 = vsub.f32 %v2245_v60, %v2297_v49  ;;  %v4287_v46 = vld [vmem:[#allocation8_spill] sm:$0xff] }
 0x214   :  { %v2547_v22 = vmul.f32 %v2390_v4, %v2543_v32  ;;  %v2567_v27 = vmul.f32 %v2408_v61, %v2563_v28  ;;  %v2576_v4 = vmul.f32 %v2421_v38, %v2572_v31  ;;  %v2585_v3 = vmul.f32 %v2428_v8, %v2581_v45 }
 0x215   :  { %v2605_v40 = vmul.f32 %v2446_v58, %v2601_v50  ;;  %v2614_v43 = vmul.f32 %v2457_v12, %v2610_v54  ;;  %v2621_v52 = vsub.f32 %v4287_v46, %v2300_v47 }
 0x216   :  { %1060 = vperm.xlu2 %1934, %v1021_v13  }
 0x217   :  { %v2625_v58 = vmul.f32 %v2465_v14, %v2621_v52 }
 0x219   :  { %v784_v9 = vpop.permute.xlu2 %783 }
 0x21e   :  { %1063 = vperm.xlu2 %1934, %v1022_v33  }
 0x221   :  { %v789_v20 = vpop.permute.xlu2 %788 }
 0x224   :  { %325 = vxpose.xlu0.b32.start [1/16] %v2482_v21, 128 }
 0x226   :  { %843 = vperm.xlu2 %1934, %v707_v10   ;;  %v2511_v10 = vmul.f32 %v2341_v59, %v2507_v56  ;;  %v2529_v59 = vmul.f32 %v2365_v5, %v2525_v42 }
 0x229   :  { %v794_v23 = vpop.permute.xlu2 %793 }
 0x22c   :  { %326 = vxpose.xlu0.b32.cont [2/16] %v2491_v6, 128  ;;  %v2616_v8 = vpop.permute.xlu0 %1039 }
 0x22e   :  { %1069 = vperm.xlu2 %1934, %v1024_v17  }
 0x231   :  { %v799_v26 = vpop.permute.xlu2 %798 }
 0x234   :  { %327 = vxpose.xlu0.b32.cont [3/16] %v2501_v55, 128 }
 0x236   :  { %1072 = vperm.xlu2 %1934, %v1025_v30  }
 0x239   :  { %v804_v19 = vpop.permute.xlu2 %803 }
 0x23c   :  { %328 = vxpose.xlu0.b32.cont [4/16] %v2511_v10, 128 }
 0x241   :  { %v2549_v5 = vpop.permute.xlu2 %1045 }
 0x244   :  { %329 = vxpose.xlu0.b32.cont [5/16] %v2520_v44, 128  ;;  %v2627_v60 = vpop.permute.xlu1 %1048 }
 0x245   :  { %851 = vxpose.xlu1.b32.start [1/16] %v774_v2, 128 }
 0x249   :  { %v809_v39 = vpop.permute.xlu2 %808 }
 0x24c   :  { %330 = vxpose.xlu0.b32.cont [6/16] %v2529_v59, 128  ;;  %v2629_v49 = vpop.permute.xlu0 %1051 }
 0x24d   :  { %852 = vxpose.xlu1.b32.cont [2/16] %v779_v0, 128 }
 0x251   :  { %v814_v41 = vpop.permute.xlu2 %813 }
 0x254   :  { %331 = vxpose.xlu0.b32.cont [7/16] %v2538_v53, 128 }
 0x255   :  { %853 = vxpose.xlu1.b32.cont [3/16] %v784_v9, 128 }
 0x259   :  { %v819_v34 = vpop.permute.xlu2 %818 }
 0x25c   :  { %332 = vxpose.xlu0.b32.cont [8/16] %v2547_v22, 128  ;;  %v2634_v15 = vpop.permute.xlu1 %1057 }
 0x25d   :  { %854 = vxpose.xlu1.b32.cont [4/16] %v789_v20, 128 }
 0x25f   :  { %741 = vadd.xlane.f32.xlu2 %v740_v7 }
 0x261   :  { %v2596_v61 = vpop.permute.xlu2 %1054 }
 0x264   :  { %333 = vxpose.xlu0.b32.cont [9/16] %v2558_v25, 128 }
 0x265   :  { %855 = vxpose.xlu1.b32.cont [5/16] %v794_v23, 128 }
 0x269   :  { %v824_v38 = vpop.permute.xlu2 %823 }
 0x26a   :  { %v834_v63 = vpop.permute.xlu0 %833 }
 0x26c   :  { %334 = vxpose.xlu0.b32.cont [10/16] %v2567_v27, 128 }
 0x26d   :  { %856 = vxpose.xlu1.b32.cont [6/16] %v799_v26, 128 }
 0x271   :  { %v829_v57 = vpop.permute.xlu2 %828 }
 0x272   :  { %v839_v47 = vpop.permute.xlu1 %838 }
 0x274   :  { %335 = vxpose.xlu0.b32.cont [11/16] %v2576_v4, 128  ;;  %v2638_v7 = vpop.permute.xlu0 %1066 }
 0x275   :  { %857 = vxpose.xlu1.b32.cont [7/16] %v804_v19, 128 }
 0x279   :  { %v2632_v12 = vpop.permute.xlu2 %1060 }
 0x27c   :  { %336 = vxpose.xlu0.b32.cont [12/16] %v2585_v3, 128 }
 0x27d   :  { %858 = vxpose.xlu1.b32.cont [8/16] %v809_v39, 128 }
 0x281   :  { %v2636_v1 = vpop.permute.xlu2 %1063 }
 0x282   :  { %v849_v14 = vpop.permute.xlu1 %848 }
 0x284   :  { %337 = vxpose.xlu0.b32.cont [13/16] %v2594_v37, 128 }
 0x285   :  { %859 = vxpose.xlu1.b32.cont [9/16] %v814_v41, 128 }
 0x289   :  { %v844_v11 = vpop.permute.xlu2 %843 }
 0x28c   :  { %338 = vxpose.xlu0.b32.cont [14/16] %v2605_v40, 128 }
 0x28d   :  { %860 = vxpose.xlu1.b32.cont [10/16] %v819_v34, 128 }
 0x291   :  { %v2640_v13 = vpop.permute.xlu2 %1069 }
 0x292   :  { %4288 = vst [vmem:[#allocation8_spill] sm:$0xff] %v2640_v13 }
 0x294   :  { %339 = vxpose.xlu0.b32.cont [15/16] %v2614_v43, 128 }
 0x295   :  { %861 = vxpose.xlu1.b32.cont [11/16] %v824_v38, 128 }
 0x299   :  { %v2643_v9 = vpop.permute.xlu2 %1072 }
 0x29c   :  { %340 = vxpose.xlu0.b32.end [16/16] %v2625_v58, 128 }
 0x29d   :  { %862 = vxpose.xlu1.b32.cont [12/16] %v829_v57, 128 }
 0x2a5   :  { %863 = vxpose.xlu1.b32.cont [13/16] %v834_v63, 128 }
 0x2ad   :  { %864 = vxpose.xlu1.b32.cont [14/16] %v839_v47, 128 }
 0x2b5   :  { %865 = vxpose.xlu1.b32.cont [15/16] %v844_v11, 128 }
 0x2bd   :  { %866 = vxpose.xlu1.b32.end [16/16] %v849_v14, 128 }
 0x2c8   :  { %v341_v33 = vpop.trf.xlu0 }
 0x2c9   :  { %v357_v2 = vmax.f32 %v2482_v21, %v341_v33 }
 0x2cb   :  { %v2646_v17 = vsub.f32 %v2478_v16, %v357_v2 }
 0x2cd   :  { %4289 = vst [vmem:[#allocation14_spill] sm:$0xff] %v2646_v17  ;;  %389 = vadd.xlane.f32.xlu2 %v2646_v17 }
 0x2d0   :  { %v342_v20 = vpop.trf.xlu0 }
 0x2d1   :  { %v358_v30 = vmax.f32 %v2491_v6, %v342_v20 }
 0x2d2   :  { %v742_v23 = vpop.xlane.xlu2 %741 }
 0x2d3   :  { %v2651_v26 = vsub.f32 %v2487_v62, %v358_v30  ;;  %v743_v0 = vrot.slane %v742_v23, 4 }
 0x2d5   :  { %v744_v19 = vadd.f32 %v743_v0, %v742_v23  ;;  %391 = vadd.xlane.f32.xlu2 %v2651_v26 }
 0x2d7   :  { %v745_v39 = vrot.slane %v744_v19, 2 }
 0x2d8   :  { %v343_v21 = vpop.trf.xlu0 }
 0x2d9   :  { %v359_v41 = vmax.f32 %v2501_v55, %v343_v21  ;;  %v746_v34 = vadd.f32 %v745_v39, %v744_v19 }
 0x2db   :  { %v2656_v16 = vsub.f32 %v2497_v24, %v359_v41  ;;  %v747_v38 = vrot.slane %v746_v34, 1 }
 0x2dd   :  { %393 = vadd.xlane.f32.xlu2 %v2656_v16  ;;  %v748_v6 = vadd.f32 %v747_v38, %v746_v34 }
 0x2df   :  { %1923 = vpush %v748_v6 }
 0x2e0   :  { %v344_v57 = vpop.trf.xlu0 }
 0x2e1   :  { %v360_v62 = vmax.f32 %v2511_v10, %v344_v57  ;;  %v752_v10 = vlaneseq }
 0x2e3   :  { %v2661_v46 = vsub.f32 %v2507_v56, %v360_v62  ;;  %v2682_v30 = vshrl.u32 %v752_v10, 7  ;;  %v2688_v23 = vand.u32 127, %v752_v10 }
 0x2e5   :  { %395 = vadd.xlane.f32.xlu2 %v2661_v46  ;;  %4290 = vst [vmem:[#allocation15_spill] sm:$0xff] %v2682_v30  ;;  %v759_v21 = vadd.s32 48, %v2682_v30  ;;  %v757_v41 = vadd.s32 32, %v2682_v30  ;;  %v760_v6 = vadd.s32 56, %v2682_v30  ;;  %v762_v10 = vadd.s32 72, %v2682_v30 }
 0x2e6   :  { %4292 = vst [vmem:[#allocation17_spill] sm:$0xff] %v2688_v23  ;;  %vm883_vm2 = vcmp.lt.s32.totalorder %v2688_v23, %v2682_v30 }
 0x2e7   :  { %vm889_vm14 = vcmp.lt.s32.totalorder %v2688_v23, %v759_v21  ;;  %vm887_vm15 = vcmp.lt.s32.totalorder %v2688_v23, %v757_v41  ;;  %vm890_vm0 = vcmp.lt.s32.totalorder %v2688_v23, %v760_v6  ;;  %vm892_vm3 = vcmp.lt.s32.totalorder %v2688_v23, %v762_v10 }
 0x2e8   :  { %v345_v63 = vpop.trf.xlu0  ;;  %v764_v41 = vadd.s32 88, %v2682_v30 }
 0x2e9   :  { %v361_v55 = vmax.f32 %v2520_v44, %v345_v63  ;;  %v2665_v47 = vpop.trf.xlu1 }
 0x2ea   :  { %vm894_vm6 = vcmp.lt.s32.totalorder %v2688_v23, %v764_v41 }
 0x2eb   :  { %v2668_v24 = vsub.f32 %v2516_v35, %v361_v55  ;;  %v761_v55 = vadd.s32 64, %v2682_v30 }
 0x2ed   :  { %397 = vadd.xlane.f32.xlu2 %v2668_v24  ;;  %vm891_vm1 = vcmp.lt.s32.totalorder %v2688_v23, %v761_v55 }
 0x2f0   :  { %v346_v11 = vpop.trf.xlu0 }
 0x2f1   :  { %v362_v14 = vmax.f32 %v2529_v59, %v346_v11  ;;  %v2672_v33 = vpop.trf.xlu1  ;;  %v2686_v59 = vadd.s32 16, %v2682_v30 }
 0x2f3   :  { %v2675_v56 = vsub.f32 %v2525_v42, %v362_v14  ;;  %4291 = vst [vmem:[#allocation16_spill] sm:$0xff] %v2686_v59  ;;  %vm885_vm12 = vcmp.lt.s32.totalorder %v2688_v23, %v2686_v59 }
 0x2f5   :  { %399 = vadd.xlane.f32.xlu2 %v2675_v56 }
 0x2f8   :  { %v347_v2 = vpop.trf.xlu0 }
 0x2f9   :  { %v363_v44 = vmax.f32 %v2538_v53, %v347_v2  ;;  %v869_v20 = vpop.trf.xlu1 }
 0x2fa   :  { %v901_v0 = vsel %vm885_vm12, %v869_v20, 0.0 }
 0x2fb   :  { %v2680_v35 = vsub.f32 %v2534_v29, %v363_v44  ;;  %v758_v29 = vadd.s32 40, %v2682_v30 }
 0x2fd   :  { %401 = vadd.xlane.f32.xlu2 %v2680_v35  ;;  %vm888_vm13 = vcmp.lt.s32.totalorder %v2688_v23, %v758_v29 }
 0x300   :  { %v2705_v2 = vpop.trf.xlu0 }
 0x301   :  { %v2690_v42 = vpop.trf.xlu1 }
 0x305   :  { %919 = vadd.xlane.f32.xlu2 %v901_v0  ;;  %v4293_v0 = vld [vmem:[#allocation11_spill] sm:$0xff] }
 0x306   :  { %vm957_vm4 = vcmp.gt.f32.partialorder %v4293_v0, 0.0 }
 0x307   :  { %v1012_v29 = vsel %vm957_vm4, 1, %v4286_v18 }
 0x309   :  { %v871_v53 = vpop.trf.xlu1 }
 0x30a   :  { %v903_v57 = vsel %vm887_vm15, %v871_v53, 0.0  ;;  %v763_v53 = vadd.s32 80, %v2682_v30 }
 0x30c   :  { %vm893_vm5 = vcmp.lt.s32.totalorder %v2688_v23, %v763_v53  ;;  %v2727_v53 = vadd.s32 24, %v2682_v30 }
 0x30e   :  { %4294 = vst [vmem:[#allocation11_spill] sm:$0xff] %v2727_v53  ;;  %vm886_vm9 = vcmp.lt.s32.totalorder %v2688_v23, %v2727_v53 }
 0x310   :  { %s1924_s2 = spop %1923 }
 0x311   :  { %v872_v19 = vpop.trf.xlu1 }
 0x312   :  { %v904_v39 = vsel %vm888_vm13, %v872_v19, 0.0  ;;  %v2712_v19 = vpop.trf.xlu0 }
 0x313   :  { %925 = vadd.xlane.f32.xlu0 %v904_v39 }
 0x319   :  { %v873_v34 = vpop.trf.xlu1 }
 0x31a   :  { %v905_v38 = vsel %vm889_vm14, %v873_v34, 0.0  ;;  %v350_v6 = vpop.trf.xlu0 }
 0x31b   :  { %927 = vadd.xlane.f32.xlu2 %v905_v38 }
 0x31d   :  { %923 = vadd.xlane.f32.xlu1 %v903_v57 }
 0x321   :  { %v874_v62 = vpop.trf.xlu1 }
 0x322   :  { %v906_v63 = vsel %vm890_vm0, %v874_v62, 0.0  ;;  %v765_v62 = vadd.s32 96, %v2682_v30  ;;  %v351_v10 = vpop.trf.xlu0 }
 0x323   :  { %929 = vadd.xlane.f32.xlu0 %v906_v63 }
 0x324   :  { %vm895_vm7 = vcmp.lt.s32.totalorder %v2688_v23, %v765_v62  ;;  %v2737_v62 = vadd.s32 8, %v2682_v30 }
 0x326   :  { %4295 = vst [vmem:[#allocation18_spill] sm:$0xff] %v2737_v62  ;;  %vm884_vm11 = vcmp.lt.s32.totalorder %v2688_v23, %v2737_v62  ;;  %v4334_v62 = vmov 0 }
 0x329   :  { %v875_v11 = vpop.trf.xlu1 }
 0x32a   :  { %v907_v14 = vsel %vm891_vm1, %v875_v11, 0.0 }
 0x32b   :  { %931 = vadd.xlane.f32.xlu0 %v907_v14  ;;  %v766_v14 = vadd.s32 104, %v2682_v30 }
 0x32d   :  { %vm896_vm8 = vcmp.lt.s32.totalorder %v2688_v23, %v766_v14 }
 0x331   :  { %v876_v44 = vpop.trf.xlu1 }
 0x332   :  { %v908_v20 = vsel %vm892_vm3, %v876_v44, 0.0 }
 0x333   :  { %933 = vadd.xlane.f32.xlu0 %v908_v20 }
 0x336   :  { %1033 = vperm.xlu1 %1933, %v1012_v29   ;;  %v767_v29 = vadd.s32 112, %v2682_v30 }
 0x338   :  { %vm897_vm10 = vcmp.lt.s32.totalorder %v2688_v23, %v767_v29  ;;  %v366_v29 = vmax.f32 %v2567_v27, %v350_v6  ;;  %v367_v27 = vmax.f32 %v2576_v4, %v351_v10 }
 0x339   :  { %v877_v39 = vpop.trf.xlu1 }
 0x33a   :  { %v909_v21 = vsel %vm893_vm5, %v877_v39, 0.0  ;;  %v352_v39 = vpop.trf.xlu0 }
 0x33b   :  { %935 = vadd.xlane.f32.xlu2 %v909_v21 }
 0x340   :  { %v2716_v34 = vpop.xlane.xlu2 %389 }
 0x341   :  { %v878_v38 = vpop.trf.xlu1 }
 0x342   :  { %v910_v57 = vsel %vm894_vm6, %v878_v38, 0.0  ;;  %v902_v38 = vsel %vm886_vm9, %v2690_v42, 0.0  ;;  %v750_v42 = vstv %s1924_s2  ;;  %v353_v14 = vpop.trf.xlu0 }
 0x343   :  { %937 = vadd.xlane.f32.xlu0 %v910_v57 }
 0x348   :  { %v2720_v63 = vpop.xlane.xlu2 %391 }
 0x349   :  { %v879_v55 = vpop.trf.xlu1 }
 0x34a   :  { %v911_v11 = vsel %vm895_vm7, %v879_v55, 0.0  ;;  %v768_v55 = vadd.s32 120, %v2682_v30  ;;  %v2760_v6 = vpop.trf.xlu0  ;;  %v4337_v30 = vmov 0 }
 0x34b   :  { %939 = vadd.xlane.f32.xlu2 %v911_v11  ;;  %v899_v11 = vsel %vm883_vm2, %v2665_v47, 0.0  ;;  %v947_v47 = vld [vmem:[%s4163_s3] sm:$0xf] }
 0x34c   :  { %vm898_vm12 = vcmp.lt.s32.totalorder %v2688_v23, %v768_v55  ;;  %v2754_v55 = vsub.f32 %v2563_v28, %v366_v29  ;;  %v368_v28 = vmax.f32 %v2585_v3, %v352_v39 }
 0x34e   :  { %4296 = vst [vmem:[#allocation19_spill] sm:$0xff] %v2754_v55  ;;  %v2773_v4 = vsub.f32 %v2581_v45, %v368_v28  ;;  %v369_v45 = vmax.f32 %v2594_v37, %v353_v14  ;;  %v4304_v14 = vld [vmem:[#allocation10_spill] sm:$0xff] }
 0x34f   :  { %vm956_vm3 = vcmp.gt.f32.partialorder %v4304_v14, 0.0 }
 0x350   :  { %v2724_v44 = vpop.xlane.xlu2 %393  ;;  %v2791_v39 = vsub.f32 %v2590_v48, %v369_v45  ;;  %v1011_v48 = vsel %vm956_vm3, 1, %v4286_v18  ;;  %v365_v45 = vmax.f32 %v2558_v25, %v2712_v19 }
 0x351   :  { %v880_v20 = vpop.trf.xlu1 }
 0x352   :  { %v912_v0 = vsel %vm896_vm8, %v880_v20, 0.0  ;;  %v2770_v59 = vpop.trf.xlu0  ;;  %vm4179_vm8 = vcmp.eq.s32.totalorder %v2616_v8, 1  ;;  %v2844_v25 = vsub.f32 %v2554_v36, %v365_v45  ;;  %v4310_v36 = vmov 0 }
 0x353   :  { %941 = vadd.xlane.f32.xlu0 %v912_v0  ;;  %v4328_v45 = vmov 0 }
 0x354   :  { %4309 = vst [vmem:[#allocation10_spill] sm:$0xff] %v2844_v25 }
 0x358   :  { %v2733_v21 = vpop.xlane.xlu2 %395 }
 0x359   :  { %v881_v41 = vpop.trf.xlu1 }
 0x35a   :  { %v913_v57 = vsel %vm897_vm10, %v881_v41, 0.0  ;;  %v900_v41 = vsel %vm884_vm11, %v2672_v33, 0.0 }
 0x35b   :  { %921 = vadd.xlane.f32.xlu0 %v902_v38  ;;  %943 = vadd.xlane.f32.xlu2 %v913_v57  ;;  %v751_v57 = vmax.f32 %v750_v42, 1.0  ;;  %v2763_v42 = vsub.f32 %v2572_v31, %v367_v27 }
 0x35d   :  { %v948_v51 = vmul.f32 %v947_v47, %v751_v57  ;;  %4297 = vst [vmem:[#allocation20_spill] sm:$0xff] %v2763_v42  ;;  %v4298_v47 = vld [vmem:[#allocation9_spill] sm:$0xff] }
 0x35e   :  { %vm955_vm13 = vcmp.gt.f32.partialorder %v4298_v47, 0.0  ;;  %4299 = vst [vmem:[#allocation9_spill] sm:$0xff] %v2773_v4 }
 0x35f   :  { %v949_v33 = vfloor.f32 %v948_v51  ;;  %v1010_v51 = vsel %vm955_vm13, 1, %v4286_v18 }
 0x360   :  { %v2746_v20 = vpop.xlane.xlu2 %397  ;;  %915 = vadd.xlane.f32.xlu1 %v899_v11  ;;  %v1762_v11 = vadd.f32 -1.0, %v751_v57  ;;  %v4300_v57 = vld [vmem:[#allocation13_spill] sm:$0xff] }
 0x361   :  { %v882_v0 = vpop.trf.xlu1  ;;  %vm960_vm14 = vcmp.gt.f32.partialorder %v4300_v57, 0.0  ;;  %4301 = vst [vmem:[#allocation13_spill] sm:$0xff] %v2791_v39 }
 0x362   :  { %v914_v38 = vsel %vm898_vm12, %v882_v0, 0.0  ;;  %v951_v0 = vmin.f32 %v949_v33, %v1762_v11  ;;  %v1015_v3 = vsel %vm960_vm14, 1, %v4286_v18  ;;  %v356_v33 = vpop.trf.xlu0  ;;  %v4302_v11 = vld [vmem:[#allocation12_spill] sm:$0xff]  ;;  %vm4178_vm12 = vcmp.eq.s32.totalorder %v2549_v5, 1 }
 0x363   :  { %917 = vadd.xlane.f32.xlu0 %v900_v41  ;;  %945 = vadd.xlane.f32.xlu2 %v914_v38  ;;  %vm958_vm1 = vcmp.gt.f32.partialorder %v4302_v11, 0.0  ;;  %v372_v28 = vmax.f32 %v2625_v58, %v356_v33  ;;  %v4307_v11 = vmov 0 }
 0x364   :  { %v972_v29 = vperm.slane %v951_v0, 0  ;;  %v973_v38 = vperm.slane %v951_v0, 2  ;;  %v1159_v57 = vperm.slane %v951_v0, 3 }
 0x366   :  { %v2776_v31 = vperm.slane %v972_v29, 0  ;;  %v2778_v10 = vperm.slane %v973_v38, 0  ;;  %v1013_v29 = vsel %vm958_vm1, 1, %v4286_v18  ;;  %v2798_v38 = vsub.f32 %v2621_v52, %v372_v28 }
 0x367   :  { %v1158_v18 = vperm.slane %v951_v0, 1  ;;  %v2832_v33 = vperm.slane %v1159_v57, 1  ;;  %v2852_v0 = vadd.s32 128, %v2688_v23  ;;  %v4313_v28 = vmov 0 }
 0x368   :  { %v2756_v53 = vpop.xlane.xlu2 %399  ;;  %407 = vadd.xlane.f32.xlu1 %v2754_v55  ;;  %4303 = vst [vmem:[#allocation12_spill] sm:$0xff] %v2798_v38  ;;  %v2916_v57 = vadd.f32 1e-12, %v2716_v34  ;;  %v364_v34 = vmax.f32 %v2547_v22, %v2705_v2  ;;  %v422_v2 = vadd.f32 1e-12, %v2720_v63  ;;  %v370_v63 = vmax.f32 %v2605_v40, %v2760_v6 }
 0x369   :  { %vm4180_vm4 = vcmp.lt.s32.totalorder %v2852_v0, 148 }
 0x36a   :  { %1935 = vrsqrt.f32 %v2916_v57  ;;  %v2956_v22 = vsub.f32 %v2543_v32, %v364_v34  ;;  %v4341_v32 = vmov 0  ;;  %v3017_v40 = vsub.f32 %v2601_v50, %v370_v63 }
 0x36b   :  { %1937 = vrsqrt.f32 %v422_v2 }
 0x36c   :  { %4333 = vst [vmem:[#allocation24_spill] sm:$0xff] %v2956_v22 }
 0x36d   :  { %4351 = vst [vmem:[#allocation25_spill] sm:$0xff] %v3017_v40 }
 0x370   :  { %v2765_v41 = vpop.xlane.xlu2 %401  ;;  %409 = vadd.xlane.f32.xlu1 %v2763_v42  ;;  %v1936_v14 = vpop.eup %1935  ;;  %v3065_v42 = vadd.f32 1e-12, %v2733_v21  ;;  %v4390_v21 = vmov 0 }
 0x371   :  { %v438_v34 = vmul.f32 %v1936_v14, %v2916_v57 }
 0x373   :  { %v439_v6 = vmul.f32 %v1936_v14, %v438_v34  ;;  %v4362_v34 = vmov 0 }
 0x375   :  { %v440_v63 = vmul.f32 0.5, %v439_v6 }
 0x377   :  { %1027 = vperm.xlu0 %1932, %v1010_v51   ;;  %v4305_v51 = vmov 0 }
 0x378   :  { %v2781_v27 = vpop.xlane.xlu2 %919  ;;  %411 = vadd.xlane.f32.xlu1 %v2773_v4  ;;  %v441_v4 = vsub.f32 1.5, %v440_v63 }
 0x37b   :  { %1042 = vperm.xlu2 %1934, %v1015_v3   ;;  %v2830_v3 = vperm.slane %v1158_v18, 1  ;;  %v4322_v18 = vmov 0 }
 0x380   :  { %413 = vadd.xlane.f32.xlu1 %v2791_v39  ;;  %v3030_v39 = vpop.eup %1937 }
 0x383   :  { %1036 = vperm.xlu2 %1934, %v1013_v29   ;;  %v4315_v29 = vmov 0 }
 0x386   :  { %v2800_v37 = vpop.xlane.xlu0 %925 }
 0x388   :  { %419 = vadd.xlane.f32.xlu1 %v2798_v38  ;;  %v4346_v38 = vmov 0 }
 0x38b   :  { %1030 = vperm.xlu2 %1934, %v1011_v48   ;;  %v4319_v48 = vmov 0 }
 0x38e   :  { %v2811_v47 = vpop.xlane.xlu2 %927 }
 0x38f   :  { %vm990_vm7 = vcmp.eq.f32.partialorder %v2811_v47, %v2776_v31 }
 0x390   :  { %v2809_v58 = vpop.xlane.xlu1 %923 }
 0x391   :  { %vm986_vm6 = vcmp.eq.f32.partialorder %v2809_v58, %v2776_v31  ;;  %vm987_vm10 = vcmp.eq.f32.partialorder %v2809_v58, %v2778_v10 }
 0x392   :  { %vm2822_vm9 = vmand %vm986_vm6, %vm4179_vm8  ;;  %vm1082_vm6 = vcmp.eq.s32.totalorder %v2629_v49, 1  ;;  %v371_v49 = vmax.f32 %v2614_v43, %v2770_v59 }
 0x393   :  { %v4306_v51 = vsel %vm2822_vm9, 4294967295, %v4305_v51  ;;  %vm2836_vm2 = vmand %vm987_vm10, %vm4179_vm8 }
 0x394   :  { %v4308_v11 = vsel %vm2836_vm2, 4294967295, %v4307_v11  ;;  %vm2859_vm10 = vmand %vm990_vm7, %vm4178_vm12  ;;  %vm4181_vm12 = vcmp.eq.s32.totalorder %v2627_v60, 1  ;;  %v2888_v43 = vsub.f32 %v2610_v54, %v371_v49  ;;  %v4325_v54 = vmov 0 }
 0x395   :  { %v4311_v36 = vsel %vm2859_vm10, 4294967295, %v4310_v36  ;;  %v4331_v49 = vmov 0 }
 0x396   :  { %v2818_v52 = vpop.xlane.xlu0 %929  ;;  %4312 = vst [vmem:[#allocation21_spill] sm:$0xff] %v4311_v36 }
 0x397   :  { %vm992_vm11 = vcmp.eq.f32.partialorder %v2818_v52, %v2776_v31  ;;  %4321 = vst [vmem:[#allocation22_spill] sm:$0xff] %v2888_v43 }
 0x39e   :  { %v932_v19 = vpop.xlane.xlu0 %931 }
 0x39f   :  { %vm1180_vm13 = vcmp.eq.f32.partialorder %v932_v19, %v2830_v3  ;;  %vm1181_vm14 = vcmp.eq.f32.partialorder %v932_v19, %v2832_v33  ;;  %vm994_vm1 = vcmp.eq.f32.partialorder %v932_v19, %v2776_v31  ;;  %vm995_vm3 = vcmp.eq.f32.partialorder %v932_v19, %v2778_v10 }
 0x3a0   :  { %vm2864_vm5 = vmand %vm1180_vm13, %vm1082_vm6 }
 0x3a1   :  { %405 = vadd.xlane.f32.xlu0 %v2844_v25  ;;  %v4314_v28 = vsel %vm2864_vm5, 4294967295, %v4313_v28  ;;  %vm1213_vm15 = vmand %vm1181_vm14, %vm1082_vm6  ;;  %vm4182_vm14 = vcmp.eq.s32.totalorder %v2596_v61, 1 }
 0x3a2   :  { %vm2870_vm0 = vmand %vm994_vm1, %vm1082_vm6 }
 0x3a3   :  { %v4316_v29 = vsel %vm2870_vm0, 4294967295, %v4315_v29  ;;  %vm2875_vm7 = vmand %vm995_vm3, %vm1082_vm6  ;;  %vm4187_vm6 = vcmp.eq.s32.totalorder %v2634_v15, 1 }
 0x3a4   :  { %vm2882_vm13 = vmand %vm1213_vm15, %vm4180_vm4 }
 0x3a5   :  { %v4320_v48 = vsel %vm2882_vm13, 4294967295, %v4319_v48  ;;  %vm2895_vm1 = vmand %vm992_vm11, %vm4181_vm12 }
 0x3a6   :  { %v934_v59 = vpop.xlane.xlu0 %933  ;;  %v4323_v18 = vsel %vm2895_vm1, 4294967295, %v4322_v18 }
 0x3a7   :  { %4324 = vst [vmem:[#allocation23_spill] sm:$0xff] %v4323_v18  ;;  %vm1182_vm15 = vcmp.eq.f32.partialorder %v934_v59, %v2830_v3  ;;  %vm1183_vm3 = vcmp.eq.f32.partialorder %v934_v59, %v2832_v33  ;;  %vm4340_vm10 = vcmp.eq.f32.partialorder %v934_v59, %v2776_v31  ;;  %v442_v18 = vmul.f32 %v1936_v14, %v441_v4 }
 0x3a8   :  { %vm2909_vm2 = vmand %vm1182_vm15, %vm4182_vm14  ;;  %vm4327_vm15 = vcmp.lt.s32.totalorder %v2852_v0, 148 }
 0x3a9   :  { %v4326_v54 = vsel %vm2909_vm2, 4294967295, %v4325_v54  ;;  %417 = vadd.xlane.f32.xlu0 %v2888_v43  ;;  %vm1215_vm4 = vmand %vm1183_vm3, %vm4182_vm14  ;;  %v4354_v43 = vmov 0  ;;  %vm453_vm2 = vweird.f32 %v422_v2 }
 0x3aa   :  { %vm2927_vm8 = vmand %vm1215_vm4, %vm4327_vm15 }
 0x3ab   :  { %v4329_v45 = vsel %vm2927_vm8, 4294967295, %v4328_v45  ;;  %vm4330_vm14 = vmmov %vm4327_vm15 }
 0x3ac   :  { %vm2947_vm11 = vmand %vm2875_vm7, %vm4330_vm14 }
 0x3ad   :  { %v4332_v49 = vsel %vm2947_vm11, 4294967295, %v4331_v49  ;;  %vm4336_vm7 = vmmov %vm4330_vm14 }
 0x3ae   :  { %v936_v19 = vpop.xlane.xlu2 %935 }
 0x3af   :  { %vm1184_vm12 = vcmp.eq.f32.partialorder %v936_v19, %v2830_v3  ;;  %vm1185_vm3 = vcmp.eq.f32.partialorder %v936_v19, %v2832_v33 }
 0x3b0   :  { %vm1217_vm1 = vmand %vm1185_vm3, %vm4187_vm6  ;;  %vm4339_vm3 = vcmp.eq.s32.totalorder %v2596_v61, 1  ;;  %v4349_v61 = vmov 0 }
 0x3b1   :  { %vm2961_vm15 = vmand %vm1184_vm12, %vm4187_vm6 }
 0x3b2   :  { %v4335_v62 = vsel %vm2961_vm15, 4294967295, %v4334_v62  ;;  %vm2967_vm14 = vmand %vm1217_vm1, %vm4336_vm7  ;;  %vm4344_vm7 = vcmp.eq.f32.partialorder %v934_v59, %v2778_v10  ;;  %v3022_v59 = vadd.f32 1e-12, %v2724_v44  ;;  %v4358_v44 = vmov 0 }
 0x3b3   :  { %v4338_v30 = vsel %vm2967_vm14, 4294967295, %v4337_v30  ;;  %vm2975_vm4 = vmand %vm4340_vm10, %vm4339_vm3  ;;  %vm4345_vm10 = vcmp.lt.s32.totalorder %v2852_v0, 148 }
 0x3b4   :  { %v4342_v32 = vsel %vm2975_vm4, 4294967295, %v4341_v32  ;;  %403 = vadd.xlane.f32.xlu2 %v2956_v22  ;;  %vm4343_vm1 = vmmov %vm4339_vm3  ;;  %vm4348_vm4 = vcmp.eq.s32.totalorder %v2632_v12, 1  ;;  %1939 = vrsqrt.f32 %v3022_v59 }
 0x3b5   :  { %vm1109_vm6 = vmand %vm4344_vm7, %vm4343_vm1  ;;  %1941 = vrsqrt.f32 %v3065_v42 }
 0x3b6   :  { %v938_v23 = vpop.xlane.xlu0 %937  ;;  %vm2994_vm3 = vmand %vm1109_vm6, %vm4345_vm10 }
 0x3b7   :  { %v4347_v38 = vsel %vm2994_vm3, 4294967295, %v4346_v38  ;;  %vm1186_vm12 = vcmp.eq.f32.partialorder %v938_v23, %v2830_v3  ;;  %vm1187_vm0 = vcmp.eq.f32.partialorder %v938_v23, %v2832_v33  ;;  %vm1000_vm7 = vcmp.eq.f32.partialorder %v938_v23, %v2776_v31  ;;  %vm4352_vm10 = vmmov %vm4348_vm4 }
 0x3b8   :  { %vm3008_vm8 = vmand %vm1186_vm12, %vm4348_vm4  ;;  %vm4353_vm4 = vcmp.lt.s32.totalorder %v2852_v0, 148  ;;  %vm454_vm3 = vweird.f32 %v3030_v39 }
 0x3b9   :  { %v4350_v61 = vsel %vm3008_vm8, 4294967295, %v4349_v61  ;;  %vm1219_vm1 = vmand %vm1187_vm0, %vm4352_vm10  ;;  %vm4356_vm0 = vcmp.eq.s32.totalorder %v2634_v15, 1  ;;  %vm4357_vm10 = vcmp.eq.f32.partialorder %v936_v19, %v2776_v31 }
 0x3ba   :  { %vm3026_vm12 = vmand %vm1219_vm1, %vm4353_vm4  ;;  %vm4361_vm1 = vcmp.eq.s32.totalorder %v2632_v12, 1  ;;  %v3067_v55 = vpop.eup %1939 }
 0x3bb   :  { %v4355_v43 = vsel %vm3026_vm12, 4294967295, %v4354_v43  ;;  %vm3043_vm13 = vmand %vm4357_vm10, %vm4356_vm0 }
 0x3bc   :  { %415 = vadd.xlane.f32.xlu2 %v3017_v40  ;;  %v4359_v44 = vsel %vm3043_vm13, 4294967295, %v4358_v44  ;;  %vm3052_vm4 = vmand %vm1000_vm7, %vm4361_vm1  ;;  %v448_v40 = vmul.f32 %v3030_v39, %v422_v2  ;;  %vm4366_vm1 = vcmp.eq.f32.partialorder %v936_v19, %v2778_v10  ;;  %vm4369_vm13 = vcmp.eq.s32.totalorder %v2632_v12, 1 }
 0x3bd   :  { %4360 = vst [vmem:[#allocation26_spill] sm:$0xff] %v4359_v44  ;;  %v4363_v34 = vsel %vm3052_vm4, 4294967295, %v4362_v34  ;;  %vm4365_vm10 = vmmov %vm4356_vm0  ;;  %vm444_vm0 = vweird.f32 %v1936_v14  ;;  %vm4370_vm4 = vcmp.eq.f32.partialorder %v938_v23, %v2778_v10  ;;  %v458_v19 = vmul.f32 %v3067_v55, %v3022_v59 }
 0x3be   :  { %v3037_v50 = vpop.xlane.xlu2 %939  ;;  %4364 = vst [vmem:[#allocation27_spill] sm:$0xff] %v4363_v34  ;;  %v449_v6 = vmul.f32 %v3030_v39, %v448_v40  ;;  %vm3077_vm6 = vmand %vm4366_vm1, %vm4365_vm10  ;;  %vm443_vm1 = vweird.f32 %v2916_v57  ;;  %vm4224_vm7 = vcmp.eq.s32.totalorder %v2638_v7, 1  ;;  %v4420_v12 = vmov 0 }
 0x3bf   :  { %vm3085_vm11 = vmand %vm4370_vm4, %vm4369_vm13  ;;  %vm1189_vm10 = vcmp.eq.f32.partialorder %v3037_v50, %v2832_v33  ;;  %vm4225_vm4 = vcmp.eq.s32.totalorder %v2636_v1, 1  ;;  %v459_v40 = vmul.f32 %v3067_v55, %v458_v19 }
 0x3c0   :  { %v450_v15 = vmul.f32 0.5, %v449_v6  ;;  %vm445_vm5 = vmor %vm443_vm1, %vm444_vm0  ;;  %v3116_v6 = vadd.f32 1e-12, %v2746_v20  ;;  %v4381_v20 = vmov 0 }
 0x3c1   :  { %vm3104_vm14 = vmand %vm1189_vm10, %vm4225_vm4  ;;  %v3108_v23 = vsel %vm445_vm5, %v1936_v14, %v442_v18  ;;  %vm1188_vm5 = vcmp.eq.f32.partialorder %v3037_v50, %v2830_v3  ;;  %vm4380_vm10 = vcmp.lt.s32.totalorder %v2852_v0, 148  ;;  %v3140_v18 = vpop.eup %1941 }
 0x3c2   :  { %4375 = vst [vmem:[#allocation28_spill] sm:$0xff] %v3108_v23  ;;  %v451_v4 = vsub.f32 1.5, %v450_v15  ;;  %vm3110_vm12 = vmor %vm453_vm2, %vm454_vm3  ;;  %vm1173_vm3 = vcmp.eq.f32.partialorder %v2809_v58, %v2832_v33  ;;  %v4386_v15 = vmov 0  ;;  %v597_v63 = vmul.f32 %v3108_v23, %v2646_v17 }
 0x3c3   :  { %vm3134_vm1 = vmand %vm3077_vm6, %vm4380_vm10  ;;  %1943 = vrsqrt.f32 %v3116_v6  ;;  %vm4392_vm6 = vcmp.eq.s32.totalorder %v2638_v7, 1  ;;  %v460_v23 = vmul.f32 0.5, %v459_v40  ;;  %v468_v22 = vmul.f32 %v3140_v18, %v3065_v42 }
 0x3c4   :  { %v4382_v20 = vsel %vm3134_vm1, 4294967295, %v4381_v20  ;;  %v452_v17 = vmul.f32 %v3030_v39, %v451_v4 }
 0x3c5   :  { %4383 = vst [vmem:[#allocation29_spill] sm:$0xff] %v4382_v20  ;;  %v4400_v20 = vmov 0  ;;  %v469_v44 = vmul.f32 %v3140_v18, %v468_v22 }
 0x3c6   :  { %v3071_v36 = vpop.xlane.xlu0 %941 }
 0x3c7   :  { %vm1191_vm13 = vcmp.eq.f32.partialorder %v3071_v36, %v2832_v33  ;;  %vm1190_vm2 = vcmp.eq.f32.partialorder %v3071_v36, %v2830_v3 }
 0x3c8   :  { %vm3120_vm0 = vmand %vm1191_vm13, %vm4224_vm7  ;;  %vm4395_vm13 = vcmp.eq.s32.totalorder %v2616_v8, 1 }
 0x3c9   :  { %vm4385_vm7 = vmmov %vm4380_vm10 }
 0x3ca   :  { %vm3148_vm4 = vmand %vm3085_vm11, %vm4385_vm7  ;;  %vm4389_vm11 = vcmp.eq.s32.totalorder %v2636_v1, 1 }
 0x3cb   :  { %v4387_v15 = vsel %vm3148_vm4, 4294967295, %v4386_v15  ;;  %vm3166_vm7 = vmand %vm1188_vm5, %vm4389_vm11  ;;  %vm464_vm5 = vweird.f32 %v3067_v55  ;;  %vm4398_vm11 = vcmp.eq.s32.totalorder %v2640_v13, 1  ;;  %v3234_v13 = vadd.f32 1e-12, %v2756_v53  ;;  %v3257_v53 = vpop.eup %1943 }
 0x3cc   :  { %4388 = vst [vmem:[#allocation31_spill] sm:$0xff] %v4387_v15  ;;  %v4391_v21 = vsel %vm3166_vm7, 4294967295, %v4390_v21  ;;  %vm3172_vm8 = vmand %vm1190_vm2, %vm4392_vm6  ;;  %vm4399_vm6 = vcmp.lt.s32.totalorder %v2852_v0, 148  ;;  %v461_v15 = vsub.f32 1.5, %v460_v23  ;;  %v478_v22 = vmul.f32 %v3257_v53, %v3116_v6 }
 0x3cd   :  { %vm3178_vm15 = vmand %vm1173_vm3, %vm4395_vm13  ;;  %1945 = vrsqrt.f32 %v3234_v13  ;;  %v3328_v23 = vadd.f32 1e-12, %v2765_v41  ;;  %v4441_v41 = vmov 0 }
 0x3ce   :  { %v3142_v14 = vpop.xlane.xlu2 %943  ;;  %vm3192_vm1 = vmand %vm3120_vm0, %vm4399_vm6  ;;  %v479_v57 = vmul.f32 %v3257_v53, %v478_v22 }
 0x3cf   :  { %4384 = vst [vmem:[#allocation30_spill] sm:$0xff] %v3142_v14  ;;  %vm1193_vm10 = vcmp.eq.f32.partialorder %v3142_v14, %v2832_v33  ;;  %v4401_v20 = vsel %vm3192_vm1, 4294967295, %v4400_v20  ;;  %vm4402_vm3 = vmmov %vm4398_vm11  ;;  %vm4403_vm13 = vcmp.eq.f32.partialorder %v3142_v14, %v2830_v3  ;;  %v3248_v14 = vsel %vm3110_vm12, %v3030_v39, %v452_v17 }
 0x3d0   :  { %vm1225_vm2 = vmand %vm1193_vm10, %vm4398_vm11  ;;  %vm463_vm10 = vweird.f32 %v3022_v59  ;;  %v4414_v59 = vmov 0  ;;  %vm4422_vm12 = vcmp.eq.f32.partialorder %v3037_v50, %v2778_v10  ;;  %v598_v39 = vmul.f32 %v3248_v14, %v2651_v26 }
 0x3d1   :  { %vm3201_vm4 = vmand %vm4403_vm13, %vm4402_vm3  ;;  %vm4412_vm3 = vcmp.eq.s32.totalorder %v2636_v1, 1  ;;  %vm4413_vm13 = vcmp.eq.f32.partialorder %v3037_v50, %v2776_v31  ;;  %v4427_v1 = vmov 0  ;;  %v4435_v50 = vmov 0 }
 0x3d2   :  { %613 = vxpose.xlu0.b32.start [1/16] %v597_v63, 128  ;;  %vm4406_vm11 = vmmov %vm4399_vm6  ;;  %v4416_v63 = vmov 0  ;;  %1947 = vrsqrt.f32 %v3328_v23 }
 0x3d3   :  { %vm3208_vm9 = vmand %vm1225_vm2, %vm4406_vm11  ;;  %vm4419_vm11 = vcmp.eq.f32.partialorder %v3071_v36, %v2776_v31 }
 0x3d4   :  { %vm4409_vm0 = vmmov %vm4399_vm6 }
 0x3d5   :  { %vm3216_vm6 = vmand %vm3104_vm14, %vm4409_vm0  ;;  %vm4418_vm14 = vcmp.eq.s32.totalorder %v2638_v7, 1 }
 0x3d6   :  { %vm3225_vm1 = vmand %vm4413_vm13, %vm4412_vm3  ;;  %v3259_v34 = vpop.xlane.xlu2 %945 }
 0x3d7   :  { %v4415_v59 = vsel %vm3225_vm1, 4294967295, %v4414_v59  ;;  %vm3229_vm2 = vmor %vm463_vm10, %vm464_vm5  ;;  %vm1172_vm5 = vcmp.eq.f32.partialorder %v2809_v58, %v2830_v3  ;;  %vm4425_vm1 = vcmp.eq.s32.totalorder %v2638_v7, 1  ;;  %v4430_v58 = vmov 0 }
 0x3d8   :  { %v4417_v63 = vsel %vm3229_vm2, 4294967295, %v4416_v63  ;;  %vm3241_vm0 = vmand %vm4419_vm11, %vm4418_vm14  ;;  %vm4253_vm14 = vcmp.eq.s32.totalorder %v2643_v9, 1  ;;  %vm1194_vm11 = vcmp.eq.f32.partialorder %v3259_v34, %v2830_v3  ;;  %v462_v7 = vmul.f32 %v3067_v55, %v461_v15  ;;  %v3352_v15 = vpop.eup %1945 }
 0x3d9   :  { %v4421_v12 = vsel %vm3241_vm0, 4294967295, %v4420_v12  ;;  %vm3266_vm13 = vmand %vm4422_vm12, %vm4412_vm3  ;;  %vm4426_vm0 = vcmp.eq.f32.partialorder %v3071_v36, %v2778_v10  ;;  %vm4429_vm12 = vcmp.eq.s32.totalorder %v2616_v8, 1  ;;  %v470_v36 = vmul.f32 0.5, %v469_v44  ;;  %v3440_v22 = vpop.eup %1947 }
 0x3da   :  { %vm3280_vm2 = vmand %vm4426_vm0, %vm4425_vm1  ;;  %vm474_vm1 = vweird.f32 %v3140_v18  ;;  %614 = vxpose.xlu0.b32.cont [2/16] %v598_v39, 128  ;;  %v2021_v8 = vmov 1.0|1.0   ;;  %v488_v39 = vmul.f32 %v3352_v15, %v3234_v13 }
 0x3db   :  { %v4428_v1 = vsel %vm3280_vm2, 4294967295, %v4427_v1  ;;  %vm1226_vm3 = vmand %vm1194_vm11, %vm4253_vm14  ;;  %v471_v25 = vsub.f32 1.5, %v470_v36 }
 0x3dc   :  { %vm3291_vm10 = vmand %vm1172_vm5, %vm4429_vm12  ;;  %vm4432_vm5 = vcmp.eq.f32.partialorder %v3259_v34, %v2832_v33 }
 0x3dd   :  { %v4431_v58 = vsel %vm3291_vm10, 4294967295, %v4430_v58  ;;  %vm1827_vm0 = vmpackc.low %vm1226_vm3, %vm3201_vm4  ;;  %vm473_vm10 = vweird.f32 %v3065_v42  ;;  %vm4433_vm4 = vcmp.lt.s32.totalorder %v2852_v0, 148  ;;  %v472_v17 = vmul.f32 %v3140_v18, %v471_v25 }
 0x3de   :  { %1828 = vmatpush.bf16.xpose.msk.msra.mxu0 %vm1827_vm0, %v2021_v8  ;;  %vm1227_vm12 = vmand %vm4432_vm5, %vm4253_vm14  ;;  %1907 = vmatpush.bf16.xpose.msk.msra.mxu2 %vm1827_vm0, %v2021_v8  ;;  %vm4439_vm5 = vnez %v4401_v20  ;;  %v3354_v4 = vpop.permute.xlu2 %1042  ;;  %v498_v25 = vmul.f32 %v3440_v22, %v3328_v23 }
 0x3df   :  { %vm1259_vm3 = vmand %vm1227_vm12, %vm4433_vm4  ;;  %vm4453_vm12 = vcmp.lt.s32.totalorder %v2852_v0, 148 }
 0x3e0   :  { %vm4434_vm2 = vmmov %vm4433_vm4 }
 0x3e1   :  { %vm3319_vm11 = vmand %vm3178_vm15, %vm4434_vm2  ;;  %vm4440_vm15 = vnez %v4417_v63  ;;  %v4447_v63 = vmov 0 }
 0x3e2   :  { %v4436_v50 = vsel %vm3319_vm11, 4294967295, %v4435_v50  ;;  %vm3323_vm7 = vmor %vm473_vm10, %vm474_vm1  ;;  %v3339_v42 = vsel %vm4440_vm15, %v3067_v55, %v462_v7  ;;  %vm4444_vm1 = vnez %v4428_v1  ;;  %v4445_v55 = vmov 0 }
 0x3e3   :  { %vm1859_vm0 = vmpackc.low %vm1259_vm3, %vm3208_vm9  ;;  %vm4255_vm3 = vcmp.eq.s32.totalorder %v3354_v4, 1  ;;  %v599_v40 = vmul.f32 %v3339_v42, %v2656_v16  ;;  %v480_v1 = vmul.f32 0.5, %v479_v57  ;;  %v4454_v7 = vmov 0  ;;  %v3452_v57 = vpop.xlane.xlu0 %921 }
 0x3e4   :  { %1860 = vmatpush.bf16.xpose.msk.msra.mxu1 %vm1859_vm0, %v2021_v8  ;;  %1915 = vmatpush.bf16.xpose.msk.msra.mxu3 %vm1859_vm0, %v2021_v8  ;;  %vm3348_vm9 = vmand %vm3266_vm13, %vm4434_vm2  ;;  %vm1174_vm13 = vcmp.eq.f32.partialorder %v2800_v37, %v2830_v3  ;;  %v3416_v36 = vsel %vm3323_vm7, %v3140_v18, %v472_v17  ;;  %vm4458_vm7 = vcmp.eq.f32.partialorder %v2800_v37, %v2776_v31  ;;  %v4459_v18 = vmov 0 }
 0x3e5   :  { %v4442_v41 = vsel %vm3348_vm9, 4294967295, %v4441_v41  ;;  %vm4443_vm10 = vmmov %vm4434_vm2  ;;  %615 = vxpose.xlu0.b32.cont [3/16] %v599_v40, 128  ;;  %v481_v19 = vsub.f32 1.5, %v480_v1  ;;  %v600_v20 = vmul.f32 %v3416_v36, %v2661_v46  ;;  %v499_v1 = vmul.f32 %v3440_v22, %v498_v25 }
 0x3e6   :  { %vm3360_vm4 = vmand %vm4444_vm1, %vm4443_vm10  ;;  %vm1175_vm1 = vcmp.eq.f32.partialorder %v2800_v37, %v2832_v33 }
 0x3e7   :  { %v4446_v55 = vsel %vm3360_vm4, 4294967295, %v4445_v55  ;;  %vm3376_vm15 = vmand %vm1174_vm13, %vm4255_vm3  ;;  %vm4450_vm13 = vnez %v4391_v21  ;;  %v489_v21 = vmul.f32 %v3352_v15, %v488_v39  ;;  %v482_v2 = vmul.f32 %v3257_v53, %v481_v19 }
 0x3e8   :  { %v4448_v63 = vsel %vm3376_vm15, 4294967295, %v4447_v63  ;;  %vm4451_vm14 = vmpackc.low %vm3172_vm8, %vm4450_vm13  ;;  %vm4463_vm13 = vnez %v4335_v62  ;;  %vm4501_vm15 = vcmp.lt.s32.totalorder %v2852_v0, 148 }
 0x3e9   :  { %1830 = vmatpush.bf16.xpose.msk.msra.mxu0 %vm4451_vm14, %v2021_v8  ;;  %vm1207_vm0 = vmand %vm1175_vm1, %vm4255_vm3  ;;  %v490_v44 = vmul.f32 0.5, %v489_v21 }
 0x3ea   :  { %vm4452_vm10 = vmmov %vm4451_vm14  ;;  %vm4467_vm14 = vnez %v4338_v30 }
 0x3eb   :  { %1908 = vmatpush.bf16.xpose.msk.msra.mxu2 %vm4452_vm10, %v2021_v8  ;;  %vm3405_vm9 = vmand %vm1207_vm0, %vm4453_vm12  ;;  %v491_v17 = vsub.f32 1.5, %v490_v44  ;;  %vm4476_vm10 = vnez %v4326_v54  ;;  %v3520_v39 = vpop.xlane.xlu0 %917  ;;  %v4499_v44 = vmov 0 }
 0x3ec   :  { %v4455_v7 = vsel %vm3405_vm9, 4294967295, %v4454_v7  ;;  %vm4456_vm8 = vmpackc.low %vm4439_vm5, %vm3216_vm6  ;;  %vm484_vm6 = vweird.f32 %v3257_v53  ;;  %vm4462_vm5 = vnez %v4350_v61  ;;  %v3493_v61 = vpop.permute.xlu2 %1036  ;;  %vm503_vm9 = vweird.f32 %v3328_v23 }
 0x3ed   :  { %1862 = vmatpush.bf16.xpose.msk.msra.mxu1 %vm4456_vm8, %v2021_v8  ;;  %vm4457_vm12 = vmmov %vm4456_vm8  ;;  %616 = vxpose.xlu0.b32.cont [4/16] %v600_v20, 128 }
 0x3ee   :  { %1916 = vmatpush.bf16.xpose.msk.msra.mxu3 %vm4457_vm12, %v2021_v8  ;;  %vm3436_vm0 = vmand %vm4458_vm7, %vm4255_vm3  ;;  %vm483_vm12 = vweird.f32 %v3116_v6  ;;  %vm494_vm3 = vweird.f32 %v3352_v15  ;;  %v500_v6 = vmul.f32 0.5, %v499_v1 }
 0x3ef   :  { %v4460_v18 = vsel %vm3436_vm0, 4294967295, %v4459_v18  ;;  %vm4464_vm8 = vmpackc.low %vm4462_vm5, %vm4463_vm13  ;;  %vm493_vm5 = vweird.f32 %v3234_v13  ;;  %vm1179_vm13 = vcmp.eq.f32.partialorder %v2818_v52, %v2832_v33  ;;  %vm4477_vm0 = vnez %v4314_v28 }
 0x3f0   :  { %vm4465_vm7 = vmmov %vm4464_vm8  ;;  %v501_v54 = vsub.f32 1.5, %v500_v6  ;;  %v4514_v13 = vmov 0 }
 0x3f1   :  { %1832 = vmatpush.bf16.xpose.msk.msra.mxu0 %vm4464_vm8, %v2021_v8  ;;  %vm485_vm1 = vmor %vm483_vm12, %vm484_vm6  ;;  %vm4466_vm8 = vnez %v4355_v43  ;;  %v492_v43 = vmul.f32 %v3352_v15, %v491_v17  ;;  %v4505_v17 = vmov 0 }
 0x3f2   :  { %v3469_v40 = vsel %vm485_vm1, %v3257_v53, %v482_v2  ;;  %vm4468_vm4 = vmpackc.low %vm4466_vm8, %vm4467_vm14  ;;  %vm1176_vm1 = vcmp.eq.f32.partialorder %v2811_v47, %v2830_v3  ;;  %vm1178_vm14 = vcmp.eq.f32.partialorder %v2818_v52, %v2830_v3  ;;  %v1034_v53 = vpop.permute.xlu1 %1033  ;;  %v502_v20 = vmul.f32 %v3440_v22, %v501_v54 }
 0x3f3   :  { %1909 = vmatpush.bf16.xpose.msk.msra.mxu2 %vm4465_vm7, %v2021_v8  ;;  %vm4469_vm6 = vmmov %vm4468_vm4  ;;  %v601_v30 = vmul.f32 %v3469_v40, %v2668_v24  ;;  %vm4472_vm7 = vcmp.eq.s32.totalorder %v2549_v5, 1  ;;  %v3611_v25 = vpop.permute.xlu0 %1027 }
 0x3f4   :  { %vm3489_vm12 = vmor %vm493_vm5, %vm494_vm3  ;;  %vm504_vm3 = vweird.f32 %v3440_v22  ;;  %v3589_v2 = vpop.permute.xlu2 %1030 }
 0x3f5   :  { %1864 = vmatpush.bf16.xpose.msk.msra.mxu1 %vm4468_vm4, %v2021_v8  ;;  %vm1177_vm4 = vcmp.eq.f32.partialorder %v2811_v47, %v2832_v33  ;;  %vm3503_vm8 = vmand %vm1176_vm1, %vm4472_vm7  ;;  %617 = vxpose.xlu0.b32.cont [5/16] %v601_v30, 128  ;;  %v3547_v28 = vsel %vm3489_vm12, %v3352_v15, %v492_v43  ;;  %v4493_v15 = vmov 0  ;;  %v4512_v30 = vmov 0 }
 0x3f6   :  { %1917 = vmatpush.bf16.xpose.msk.msra.mxu3 %vm4469_vm6, %v2021_v8  ;;  %vm4475_vm6 = vcmp.eq.s32.totalorder %v2627_v60, 1  ;;  %vm4478_vm11 = vmpackc.low %vm4476_vm10, %vm4477_vm0  ;;  %vm1076_vm0 = vcmp.eq.s32.totalorder %v1034_v53, 1  ;;  %vm4488_vm10 = vnez %v4329_v45  ;;  %v4495_v45 = vmov 0 }
 0x3f7   :  { %vm1211_vm5 = vmand %vm1179_vm13, %vm4475_vm6  ;;  %v4520_v53 = vmov 0 }
 0x3f8   :  { %vm4479_vm1 = vmmov %vm4472_vm7 }
 0x3f9   :  { %1834 = vmatpush.bf16.xpose.msk.msra.mxu0 %vm4478_vm11, %v2021_v8  ;;  %vm1209_vm7 = vmand %vm1177_vm4, %vm4479_vm1  ;;  %vm4485_vm4 = vcmp.lt.s32.totalorder %v2852_v0, 148 }
 0x3fa   :  { %vm4480_vm13 = vmmov %vm4478_vm11  ;;  %v916_v62 = vpop.xlane.xlu1 %915 }
 0x3fb   :  { %1910 = vmatpush.bf16.xpose.msk.msra.mxu2 %vm4480_vm13, %v2021_v8  ;;  %vm3530_vm2 = vmand %vm1178_vm14, %vm4475_vm6 }
 0x3fc   :  { %vm3534_vm11 = vmor %vm503_vm9, %vm504_vm3  ;;  %vm4489_vm9 = vnez %v4320_v48  ;;  %v602_v48 = vmul.f32 %v3547_v28, %v2675_v56 }
 0x3fd   :  { %vm3540_vm1 = vmand %vm1211_vm5, %vm4485_vm4  ;;  %v3639_v1 = vsel %vm3534_vm11, %v3440_v22, %v502_v20  ;;  %vm4270_vm11 = vcmp.eq.s32.totalorder %v3611_v25, 1 }
 0x3fe   :  { %vm4490_vm14 = vmpackc.low %vm4488_vm10, %vm4489_vm9  ;;  %vm1169_vm10 = vcmp.eq.f32.partialorder %v2781_v27, %v2832_v33  ;;  %618 = vxpose.xlu0.b32.cont [6/16] %v602_v48, 128  ;;  %v603_v6 = vmul.f32 %v3639_v1, %v2680_v35 }
 0x3ff   :  { %1866 = vmatpush.bf16.xpose.msk.msra.mxu1 %vm4490_vm14, %v2021_v8  ;;  %vm4491_vm3 = vmmov %vm4490_vm14 }
 0x400   :  { %1918 = vmatpush.bf16.xpose.msk.msra.mxu3 %vm4491_vm3, %v2021_v8  ;;  %vm4492_vm5 = vmmov %vm4485_vm4  ;;  %vm1168_vm4 = vcmp.eq.f32.partialorder %v2781_v27, %v2830_v3  ;;  %vm4497_vm3 = vcmp.eq.f32.partialorder %v2781_v27, %v2778_v10 }
 0x401   :  { %vm3563_vm12 = vmand %vm1209_vm7, %vm4492_vm5  ;;  %vm4269_vm7 = vcmp.eq.s32.totalorder %v3493_v61, 1 }
 0x402   :  { %v4494_v15 = vsel %vm3563_vm12, 4294967295, %v4493_v15  ;;  %vm1835_vm13 = vmpackc.low %vm3530_vm2, %vm3503_vm8 }
 0x403   :  { %vm3583_vm9 = vmand %vm1168_vm4, %vm1076_vm0  ;;  %1836 = vmatpush.bf16.xpose.msk.msra.mxu0 %vm1835_vm13, %v2021_v8  ;;  %vm1171_vm4 = vcmp.eq.f32.partialorder %v3452_v57, %v2832_v33  ;;  %1911 = vmatpush.bf16.xpose.msk.msra.mxu2 %vm1835_vm13, %v2021_v8 }
 0x404   :  { %v4496_v45 = vsel %vm3583_vm9, 4294967295, %v4495_v45  ;;  %vm1201_vm14 = vmand %vm1169_vm10, %vm1076_vm0  ;;  %vm4498_vm10 = vcmp.eq.f32.partialorder %v2781_v27, %v2776_v31  ;;  %v4502_v27 = vmov 0 }
 0x405   :  { %vm1095_vm5 = vmand %vm4497_vm3, %vm1076_vm0 }
 0x406   :  { %vm3607_vm6 = vmand %vm4498_vm10, %vm1076_vm0  ;;  %vm4268_vm0 = vcmp.eq.s32.totalorder %v3589_v2, 1  ;;  %vm1170_vm10 = vcmp.eq.f32.partialorder %v3452_v57, %v2830_v3  ;;  %619 = vxpose.xlu0.b32.cont [7/16] %v603_v6, 128 }
 0x407   :  { %v4500_v44 = vsel %vm3607_vm6, 4294967295, %v4499_v44  ;;  %vm1203_vm3 = vmand %vm1171_vm4, %vm4269_vm7  ;;  %vm984_vm4 = vcmp.eq.f32.partialorder %v3452_v57, %v2776_v31 }
 0x408   :  { %vm3623_vm9 = vmand %vm1201_vm14, %vm4501_vm15 }
 0x409   :  { %v4503_v27 = vsel %vm3623_vm9, 4294967295, %v4502_v27  ;;  %vm4504_vm6 = vmmov %vm4501_vm15  ;;  %vm4507_vm15 = vnez %v4494_v15 }
 0x40a   :  { %vm3632_vm12 = vmand %vm1095_vm5, %vm4504_vm6  ;;  %vm1166_vm5 = vcmp.eq.f32.partialorder %v3520_v39, %v2830_v3 }
 0x40b   :  { %v4506_v17 = vsel %vm3632_vm12, 4294967295, %v4505_v17  ;;  %vm4508_vm2 = vmpackc.low %vm3540_vm1, %vm4507_vm15  ;;  %vm4517_vm15 = vnez %v4308_v11  ;;  %vm4540_vm12 = vcmp.eq.s32.totalorder %v3589_v2, 1 }
 0x40c   :  { %1868 = vmatpush.bf16.xpose.msk.msra.mxu1 %vm4508_vm2, %v2021_v8  ;;  %vm4509_vm8 = vmmov %vm4508_vm2  ;;  %vm1164_vm2 = vcmp.eq.f32.partialorder %v916_v62, %v2830_v3  ;;  %v4532_v3 = vmov 0 }
 0x40d   :  { %1919 = vmatpush.bf16.xpose.msk.msra.mxu3 %vm4509_vm8, %v2021_v8  ;;  %vm3655_vm13 = vmand %vm1170_vm10, %vm4269_vm7 }
 0x40e   :  { %vm3662_vm14 = vmand %vm1203_vm3, %vm4504_vm6 }
 0x40f   :  { %v4513_v30 = vsel %vm3662_vm14, 4294967295, %v4512_v30  ;;  %vm3670_vm1 = vmand %vm1166_vm5, %vm4268_vm0  ;;  %vm4527_vm5 = vnez %v4431_v58 }
 0x410   :  { %v4515_v13 = vsel %vm3670_vm1, 4294967295, %v4514_v13  ;;  %vm4516_vm10 = vmmov %vm4504_vm6  ;;  %vm4522_vm6 = vnez %v4496_v45 }
 0x411   :  { %vm3680_vm3 = vmand %vm4517_vm15, %vm4516_vm10  ;;  %vm4531_vm15 = vcmp.lt.s32.totalorder %v2852_v0, 148 }
 0x412   :  { %vm3689_vm8 = vmand %vm984_vm4, %vm4269_vm7  ;;  %vm985_vm4 = vcmp.eq.f32.partialorder %v3452_v57, %v2778_v10  ;;  %vm4526_vm7 = vnez %v4448_v63  ;;  %v4582_v63 = vld [vmem:[#allocation26_spill] sm:$0xff]  ;;  %v4590_v57 = vld [vmem:[#allocation29_spill] sm:$0xff] }
 0x413   :  { %v4521_v53 = vsel %vm3689_vm8, 4294967295, %v4520_v53  ;;  %vm3699_vm10 = vmand %vm1164_vm2, %vm4270_vm11  ;;  %vm4529_vm2 = vcmp.eq.s32.totalorder %v3493_v61, 1 }
 0x414   :  { %vm4528_vm1 = vmpackc.low %vm4526_vm7, %vm4527_vm5  ;;  %vm4534_vm7 = vnez %v4455_v7  ;;  %v4588_v7 = vld [vmem:[#allocation31_spill] sm:$0xff] }
 0x415   :  { %1838 = vmatpush.bf16.xpose.msk.msra.mxu0 %vm4528_vm1, %v2021_v8  ;;  %vm1097_vm11 = vmand %vm985_vm4, %vm4529_vm2  ;;  %vm4538_vm2 = vcmp.eq.s32.totalorder %v3354_v4, 1  ;;  %vm4539_vm4 = vcmp.eq.f32.partialorder %v2800_v37, %v2778_v10  ;;  %v4607_v37 = vld [vmem:[#allocation10_spill] sm:$0xff] }
 0x416   :  { %vm4530_vm0 = vmmov %vm4528_vm1 }
 0x417   :  { %1912 = vmatpush.bf16.xpose.msk.msra.mxu2 %vm4530_vm0, %v2021_v8  ;;  %vm3725_vm8 = vmand %vm1097_vm11, %vm4531_vm15  ;;  %vm4535_vm0 = vnez %v4436_v50  ;;  %vm1167_vm15 = vcmp.eq.f32.partialorder %v3520_v39, %v2832_v33 }
 0x418   :  { %v4533_v3 = vsel %vm3725_vm8, 4294967295, %v4532_v3  ;;  %vm4536_vm5 = vmpackc.low %vm4534_vm7, %vm4535_vm0  ;;  %vm1165_vm7 = vcmp.eq.f32.partialorder %v916_v62, %v2832_v33 }
 0x419   :  { %1870 = vmatpush.bf16.xpose.msk.msra.mxu1 %vm4536_vm5, %v2021_v8  ;;  %vm4537_vm11 = vmmov %vm4536_vm5  ;;  %vm4541_vm5 = vcmp.lt.s32.totalorder %v2852_v0, 148 }
 0x41a   :  { %1920 = vmatpush.bf16.xpose.msk.msra.mxu3 %vm4537_vm11, %v2021_v8  ;;  %vm1101_vm1 = vmand %vm4539_vm4, %vm4538_vm2  ;;  %vm4544_vm11 = vcmp.eq.s32.totalorder %v3611_v25, 1 }
 0x41b   :  { %vm1199_vm8 = vmand %vm1167_vm15, %vm4540_vm12 }
 0x41c   :  { %vm3760_vm9 = vmand %vm1101_vm1, %vm4541_vm5  ;;  %vm4546_vm1 = vnez %v4515_v13  ;;  %v4599_v13 = vld [vmem:[#allocation24_spill] sm:$0xff] }
 0x41d   :  { %vm1197_vm14 = vmand %vm1165_vm7, %vm4544_vm11  ;;  %vm4551_vm7 = vcmp.eq.s32.totalorder %v2549_v5, 1  ;;  %vm4552_vm11 = vcmp.eq.f32.partialorder %v2811_v47, %v2778_v10  ;;  %v4559_v5 = vmov 0  ;;  %v4562_v47 = vmov 0 }
 0x41e   :  { %vm4545_vm12 = vmpackc.low %vm3655_vm13, %vm4522_vm6  ;;  %vm4558_vm6 = vcmp.eq.f32.partialorder %v2818_v52, %v2778_v10  ;;  %v408_v52 = vpop.xlane.xlu1 %407 }
 0x41f   :  { %1840 = vmatpush.bf16.xpose.msk.msra.mxu0 %vm4545_vm12, %v2021_v8  ;;  %vm1841_vm4 = vmpackc.low %vm4546_vm1, %vm3699_vm10  ;;  %vm4553_vm10 = vnez %v4513_v30  ;;  %vm4554_vm1 = vnez %v4503_v27 }
 0x420   :  { %vm4547_vm15 = vmmov %vm4545_vm12 }
 0x421   :  { %1913 = vmatpush.bf16.xpose.msk.msra.mxu2 %vm4547_vm15, %v2021_v8  ;;  %vm4548_vm2 = vmmov %vm4541_vm5 }
 0x422   :  { %vm3789_vm5 = vmand %vm1199_vm8, %vm4548_vm2  ;;  %vm4557_vm8 = vcmp.eq.s32.totalorder %v2627_v60, 1  ;;  %v406_v60 = vpop.xlane.xlu0 %405 }
 0x423   :  { %vm1103_vm12 = vmand %vm4552_vm11, %vm4551_vm7  ;;  %v429_v33 = vadd.f32 1e-12, %v406_v60 }
 0x424   :  { %vm4555_vm0 = vmpackc.low %vm4553_vm10, %vm4554_vm1 }
 0x425   :  { %1872 = vmatpush.bf16.xpose.msk.msra.mxu1 %vm4555_vm0, %v2021_v8  ;;  %vm4556_vm13 = vmmov %vm4555_vm0  ;;  %1949 = vrsqrt.f32 %v429_v33 }
 0x426   :  { %1921 = vmatpush.bf16.xpose.msk.msra.mxu3 %vm4556_vm13, %v2021_v8  ;;  %vm1105_vm15 = vmand %vm4558_vm6, %vm4557_vm8  ;;  %vm980_vm8 = vcmp.eq.f32.partialorder %v3520_v39, %v2776_v31  ;;  %vm978_vm6 = vcmp.eq.f32.partialorder %v916_v62, %v2776_v31  ;;  %v410_v4 = vpop.xlane.xlu1 %409 }
 0x427   :  { %vm3817_vm7 = vmand %vm1103_vm12, %vm4548_vm2  ;;  %1842 = vmatpush.bf16.xpose.msk.msra.mxu0 %vm1841_vm4, %v2021_v8  ;;  %v3895_v19 = vadd.f32 1e-12, %v410_v4 }
 0x428   :  { %v4560_v5 = vsel %vm3817_vm7, 4294967295, %v4559_v5  ;;  %vm4561_vm0 = vmmov %vm4548_vm2 }
 0x429   :  { %vm3823_vm11 = vmand %vm1105_vm15, %vm4561_vm0  ;;  %1914 = vmatpush.bf16.xpose.msk.msra.mxu2 %vm1841_vm4, %v2021_v8  ;;  %vm4565_vm15 = vcmp.eq.s32.totalorder %v3589_v2, 1  ;;  %vm979_vm4 = vcmp.eq.f32.partialorder %v916_v62, %v2778_v10 }
 0x42a   :  { %v4563_v47 = vsel %vm3823_vm11, 4294967295, %v4562_v47  ;;  %vm4564_vm1 = vmmov %vm4561_vm0  ;;  %vm4566_vm0 = vcmp.eq.s32.totalorder %v3611_v25, 1 }
 0x42b   :  { %vm1229_vm13 = vmand %vm1197_vm14, %vm4564_vm1  ;;  %vm981_vm14 = vcmp.eq.f32.partialorder %v3520_v39, %v2778_v10 }
 0x42c   :  { %vm1873_vm12 = vmpackc.low %vm3789_vm5, %vm1229_vm13 }
 0x42d   :  { %vm1092_vm2 = vmand %vm980_vm8, %vm4565_vm15  ;;  %1874 = vmatpush.bf16.xpose.msk.msra.mxu1 %vm1873_vm12, %v2021_v8  ;;  %vm4569_vm8 = vcmp.lt.s32.totalorder %v2852_v0, 148 }
 0x42e   :  { %vm1090_vm10 = vmand %vm978_vm6, %vm4566_vm0  ;;  %1922 = vmatpush.bf16.xpose.msk.msra.mxu3 %vm1873_vm12, %v2021_v8  ;;  %vm4570_vm6 = vnez %v4342_v32  ;;  %v430_v32 = vadd.f32 1e-12, %v408_v52  ;;  %v412_v15 = vpop.xlane.xlu1 %411  ;;  %v4608_v52 = vld [vmem:[#allocation8_spill] sm:$0xff] }
 0x42f   :  { %vm4567_vm5 = vmmov %vm4565_vm15  ;;  %v3898_v25 = vadd.f32 1e-12, %v412_v15 }
 0x430   :  { %vm1093_vm1 = vmand %vm981_vm14, %vm4567_vm5  ;;  %vm4575_vm5 = vnez %v4332_v49  ;;  %v4580_v49 = vld [vmem:[#allocation27_spill] sm:$0xff] }
 0x431   :  { %vm1843_vm13 = vmpackc.low %vm1092_vm2, %vm1090_vm10 }
 0x432   :  { %vm4568_vm7 = vmmov %vm4566_vm0  ;;  %1844 = vmatmul.msk.bf16.vlgmr.msra.gmra.mxu0 %vm1843_vm13, %v2021_v8  ;;  %vm4571_vm0 = vnez %v4316_v29  ;;  %v404_v29 = vpop.xlane.xlu2 %403  ;;  %vm4578_vm13 = vnez %v4500_v44 }
 0x433   :  { %vm1091_vm11 = vmand %vm979_vm4, %vm4568_vm7  ;;  %vm4574_vm7 = vnez %v4347_v38  ;;  %v428_v50 = vadd.f32 1e-12, %v404_v29  ;;  %v1950_v38 = vpop.eup %1949 }
 0x434   :  { %vm1129_vm15 = vmand %vm1093_vm1, %vm4569_vm8  ;;  %v518_v61 = vmul.f32 %v1950_v38, %v429_v33 }
 0x435   :  { %vm4572_vm12 = vmpackc.low %vm4570_vm6, %vm4571_vm0  ;;  %1951 = vrsqrt.f32 %v428_v50  ;;  %vm4585_vm0 = vnez %v4533_v3 }
 0x436   :  { %1852 = vmatmul.msk.bf16.vlgmr.msra.gmra.mxu2 %vm4572_vm12, %v2021_v8  ;;  %vm4573_vm14 = vmmov %vm4569_vm8  ;;  %vm4581_vm8 = vnez %v4580_v49  ;;  %1953 = vrsqrt.f32 %v430_v32  ;;  %vm4586_vm12 = vnez %v4506_v17  ;;  %v519_v21 = vmul.f32 %v1950_v38, %v518_v61  ;;  %v4616_v49 = vld [vmem:[#allocation23_spill] sm:$0xff] }
 0x437   :  { %vm1127_vm10 = vmand %vm1091_vm11, %vm4573_vm14  ;;  %vm4577_vm11 = vnez %v4521_v53  ;;  %1955 = vrsqrt.f32 %v3895_v19 }
 0x438   :  { %vm1875_vm2 = vmpackc.low %vm1129_vm15, %vm1127_vm10  ;;  %vm4583_vm15 = vnez %v4582_v63  ;;  %vm4589_vm10 = vnez %v4588_v7  ;;  %v520_v20 = vmul.f32 0.5, %v519_v21  ;;  %1957 = vrsqrt.f32 %v3898_v25  ;;  %v4618_v63 = vld [vmem:[#allocation21_spill] sm:$0xff]  ;;  %v4622_v7 = vld [vmem:[#allocation19_spill] sm:$0xff]  ;;  %v418_v21 = vpop.xlane.xlu0 %417 }
 0x439   :  { %1876 = vmatmul.msk.bf16.vlgmr.msra.gmra.mxu1 %vm1875_vm2, %v2021_v8  ;;  %vm4576_vm1 = vmpackc.low %vm4574_vm7, %vm4575_vm5  ;;  %vm4591_vm2 = vnez %v4590_v57 }
 0x43a   :  { %1884 = vmatmul.msk.bf16.vlgmr.msra.gmra.mxu3 %vm4576_vm1, %v2021_v8  ;;  %vm4579_vm4 = vmpackc.low %vm4577_vm11, %vm4578_vm13  ;;  %v521_v17 = vsub.f32 1.5, %v520_v20  ;;  %vm513_vm1 = vweird.f32 %v428_v50  ;;  %vm4593_vm11 = vnez %v4460_v18  ;;  %vm4594_vm13 = vnez %v4306_v51  ;;  %v416_v4 = vpop.xlane.xlu2 %415 }
 0x43b   :  { %vm4584_vm6 = vmpackc.low %vm4581_vm8, %vm4583_vm15  ;;  %v1952_v39 = vpop.eup %1951  ;;  %vm4596_vm15 = vnez %v4421_v12  ;;  %v414_v12 = vpop.xlane.xlu1 %413 }
 0x43c   :  { %vm4587_vm14 = vmpackc.low %vm4585_vm0, %vm4586_vm12  ;;  %v508_v23 = vmul.f32 %v1952_v39, %v428_v50  ;;  %v1954_v54 = vpop.eup %1953  ;;  %vm514_vm5 = vweird.f32 %v1952_v39  ;;  %v522_v6 = vmul.f32 %v1950_v38, %v521_v17  ;;  %v3933_v43 = vadd.f32 1e-12, %v414_v12 }
 0x43d   :  { %vm4592_vm7 = vmpackc.low %vm4589_vm10, %vm4591_vm2  ;;  %v528_v45 = vmul.f32 %v1954_v54, %v430_v32  ;;  %v3906_v22 = vpop.eup %1955  ;;  %vm4602_vm10 = vnez %v4442_v41  ;;  %v4604_v41 = vld [vmem:[#allocation30_spill] sm:$0xff] }
 0x43e   :  { %v509_v48 = vmul.f32 %v1952_v39, %v508_v23  ;;  %vm515_vm8 = vmor %vm513_vm1, %vm514_vm5  ;;  %vm523_vm5 = vweird.f32 %v429_v33  ;;  %vm534_vm1 = vweird.f32 %v1954_v54  ;;  %v1958_v3 = vpop.eup %1957  ;;  %1959 = vrsqrt.f32 %v3933_v43 }
 0x43f   :  { %v529_v27 = vmul.f32 %v1954_v54, %v528_v45  ;;  %vm4600_vm12 = vmpackc.low %vm3760_vm9, %vm3680_vm3  ;;  %vm1006_vm3 = vcmp.eq.f32.partialorder %v4604_v41, %v2776_v31  ;;  %v548_v50 = vmul.f32 %v1958_v3, %v3898_v25  ;;  %v435_v23 = vadd.f32 1e-12, %v418_v21 }
 0x440   :  { %v510_v2 = vmul.f32 0.5, %v509_v48 }
 0x441   :  { %v530_v51 = vmul.f32 0.5, %v529_v27 }
 0x442   :  { %1846 = vmatmul.msk.bf16.gmra.mxu0 %vm4579_vm4, %v2021_v8  ;;  %v511_v44 = vsub.f32 1.5, %v510_v2  ;;  %vm4595_vm4 = vmpackc.low %vm4593_vm11, %vm4594_vm13  ;;  %vm533_vm11 = vweird.f32 %v430_v32  ;;  %vm1009_vm13 = vcmp.eq.f32.partialorder %v3259_v34, %v2778_v10 }
 0x443   :  { %v531_v53 = vsub.f32 1.5, %v530_v51  ;;  %v420_v2 = vpop.xlane.xlu1 %419 }
 0x444   :  { %v512_v62 = vmul.f32 %v1952_v39, %v511_v44 }
 0x445   :  { %v532_v29 = vmul.f32 %v1954_v54, %v531_v53 }
 0x446   :  { %1854 = vmatmul.msk.bf16.gmra.mxu2 %vm4584_vm6, %v2021_v8  ;;  %vm4597_vm6 = vnez %v4415_v59  ;;  %v3914_v30 = vsel %vm515_vm8, %v1952_v39, %v512_v62  ;;  %v538_v59 = vmul.f32 %v3906_v22, %v3895_v19  ;;  %vm1008_vm8 = vcmp.eq.f32.partialorder %v3259_v34, %v2776_v31 }
 0x447   :  { %vm4598_vm0 = vmpackc.low %vm4596_vm15, %vm4597_vm6  ;;  %v604_v18 = vmul.f32 %v3914_v30, %v4599_v13  ;;  %vm4609_vm15 = vcmp.eq.s32.totalorder %v4608_v52, 1  ;;  %v3966_v31 = vadd.f32 1e-12, %v416_v4 }
 0x448   :  { %vm3953_vm6 = vmand %vm1006_vm3, %vm4609_vm15  ;;  %vm4617_vm3 = vnez %v4616_v49 }
 0x449   :  { %1878 = vmatmul.msk.bf16.gmra.mxu1 %vm4587_vm14, %v2021_v8  ;;  %vm4601_vm14 = vnez %v4446_v55  ;;  %620 = vxpose.xlu0.b32.cont [8/16] %v604_v18, 128  ;;  %v539_v55 = vmul.f32 %v3906_v22, %v538_v59  ;;  %1961 = vrsqrt.f32 %v3966_v31  ;;  %v4627_v18 = vld [vmem:[#allocation9_spill] sm:$0xff] }
 0x44a   :  { %1886 = vmatmul.msk.bf16.gmra.mxu3 %vm4592_vm7, %v2021_v8  ;;  %vm4603_vm2 = vmpackc.low %vm4601_vm14, %vm4602_vm10  ;;  %vm524_vm7 = vweird.f32 %v1950_v38  ;;  %1963 = vrsqrt.f32 %v435_v23 }
 0x44b   :  { %vm525_vm9 = vmor %vm523_vm5, %vm524_vm7  ;;  %v540_v32 = vmul.f32 0.5, %v539_v55 }
 0x44c   :  { %v3936_v11 = vsel %vm525_vm9, %v1950_v38, %v522_v6  ;;  %vm4614_vm7 = vmmov %vm4609_vm15  ;;  %v549_v38 = vmul.f32 %v1958_v3, %v548_v50  ;;  %v4629_v50 = vld [vmem:[#allocation25_spill] sm:$0xff] }
 0x44d   :  { %v605_v60 = vmul.f32 %v3936_v11, %v4607_v37  ;;  %v541_v34 = vsub.f32 1.5, %v540_v32 }
 0x44f   :  { %v542_v61 = vmul.f32 %v3906_v22, %v541_v34 }
 0x451   :  { %621 = vxpose.xlu0.b32.cont [9/16] %v605_v60, 128 }
 0x452   :  { %1848 = vmatmul.msk.bf16.gmra.mxu0 %vm4595_vm4, %v2021_v8  ;;  %vm3942_vm4 = vmor %vm533_vm11, %vm534_vm1  ;;  %vm4615_vm1 = vcmp.lt.s32.totalorder %v2852_v0, 148  ;;  %vm4619_vm11 = vnez %v4618_v63  ;;  %v550_v0 = vmul.f32 0.5, %v549_v38 }
 0x453   :  { %vm4621_vm15 = vmmov %vm4615_vm1 }
 0x456   :  { %1856 = vmatmul.msk.bf16.gmra.mxu2 %vm4598_vm0, %v2021_v8  ;;  %vm1007_vm0 = vcmp.eq.f32.partialorder %v4604_v41, %v2778_v10  ;;  %v3972_v10 = vsel %vm3942_vm4, %v1954_v54, %v532_v29 }
 0x457   :  { %vm1119_vm5 = vmand %vm1007_vm0, %vm4614_vm7  ;;  %v606_v57 = vmul.f32 %v3972_v10, %v4622_v7 }
 0x458   :  { %vm1155_vm0 = vmand %vm1119_vm5, %vm4621_vm15  ;;  %vm554_vm5 = vweird.f32 %v1958_v3  ;;  %vm573_vm15 = vweird.f32 %v3966_v31 }
 0x459   :  { %1880 = vmatmul.msk.bf16.gmra.mxu1 %vm4600_vm12, %v2021_v8  ;;  %vm4612_vm12 = vcmp.eq.s32.totalorder %v2643_v9, 1  ;;  %v1960_v9 = vpop.eup %1959  ;;  %622 = vxpose.xlu0.b32.cont [10/16] %v606_v57, 128 }
 0x45a   :  { %1888 = vmatmul.msk.bf16.gmra.mxu3 %vm4603_vm2, %v2021_v8  ;;  %vm1121_vm14 = vmand %vm1009_vm13, %vm4612_vm12  ;;  %v558_v39 = vmul.f32 %v1960_v9, %v3933_v43  ;;  %v1962_v15 = vpop.eup %1961 }
 0x45b   :  { %vm4613_vm10 = vmmov %vm4612_vm12  ;;  %vm4623_vm12 = vnez %v4563_v47  ;;  %v568_v44 = vmul.f32 %v1962_v15, %v3966_v31 }
 0x45c   :  { %vm1120_vm2 = vmand %vm1008_vm8, %vm4613_vm10  ;;  %v559_v54 = vmul.f32 %v1960_v9, %v558_v39 }
 0x45d   :  { %vm1157_vm9 = vmand %vm1121_vm14, %vm4615_vm1  ;;  %vm4624_vm14 = vnez %v4560_v5  ;;  %v551_v5 = vsub.f32 1.5, %v550_v0  ;;  %vm553_vm1 = vweird.f32 %v3898_v25  ;;  %v569_v62 = vmul.f32 %v1962_v15, %v568_v44  ;;  %v4631_v0 = vld [vmem:[#allocation12_spill] sm:$0xff] }
 0x45e   :  { %vm4620_vm13 = vmpackc.low %vm4617_vm3, %vm4619_vm11  ;;  %v560_v20 = vmul.f32 0.5, %v559_v54  ;;  %vm564_vm3 = vweird.f32 %v1960_v9  ;;  %vm563_vm11 = vweird.f32 %v3933_v43 }
 0x45f   :  { %vm1857_vm8 = vmpackc.low %vm1120_vm2, %vm3953_vm6  ;;  %vm544_vm6 = vweird.f32 %v3906_v22  ;;  %vm543_vm2 = vweird.f32 %v3895_v19  ;;  %v552_v45 = vmul.f32 %v1958_v3, %v551_v5  ;;  %v436_v19 = vadd.f32 1e-12, %v420_v2 }
 0x460   :  { %vm1889_vm4 = vmpackc.low %vm1157_vm9, %vm1155_vm0  ;;  %v561_v17 = vsub.f32 1.5, %v560_v20  ;;  %v570_v6 = vmul.f32 0.5, %v569_v62 }
 0x461   :  { %vm4625_vm10 = vmpackc.low %vm4623_vm12, %vm4624_vm14  ;;  %1965 = vrsqrt.f32 %v436_v19  ;;  %vm583_vm12 = vweird.f32 %v435_v23 }
 0x462   :  { %1850 = vmatmul.msk.bf16.gmra.mxu0 %vm4620_vm13, %v2021_v8  ;;  %vm545_vm7 = vmor %vm543_vm2, %vm544_vm6  ;;  %v562_v59 = vmul.f32 %v1960_v9, %v561_v17  ;;  %v571_v55 = vsub.f32 1.5, %v570_v6  ;;  %vm593_vm6 = vweird.f32 %v436_v19 }
 0x463   :  { %v4000_v47 = vsel %vm545_vm7, %v3906_v22, %v542_v61  ;;  %vm555_vm9 = vmor %vm553_vm1, %vm554_vm5  ;;  %v1964_v22 = vpop.eup %1963 }
 0x464   :  { %v4006_v27 = vsel %vm555_vm9, %v1958_v3, %v552_v45  ;;  %v578_v12 = vmul.f32 %v1964_v22, %v435_v23  ;;  %vm565_vm13 = vmor %vm563_vm11, %vm564_vm3  ;;  %v4628_v3 = vld [vmem:[#allocation13_spill] sm:$0xff]  ;;  %v572_v33 = vmul.f32 %v1962_v15, %v571_v55 }
 0x465   :  { %v608_v51 = vmul.f32 %v4006_v27, %v4627_v18  ;;  %v4011_v25 = vsel %vm565_vm13, %v1960_v9, %v562_v59  ;;  %v4630_v9 = vld [vmem:[#allocation22_spill] sm:$0xff] }
 0x466   :  { %1858 = vmatmul.msk.bf16.gmra.mxu2 %vm1857_vm8, %v2021_v8  ;;  %v579_v53 = vmul.f32 %v1964_v22, %v578_v12  ;;  %v609_v58 = vmul.f32 %v4011_v25, %v4628_v3  ;;  %vm574_vm8 = vweird.f32 %v1962_v15 }
 0x467   :  { %v1966_v41 = vpop.eup %1965  ;;  %vm575_vm0 = vmor %vm573_vm15, %vm574_vm8 }
 0x468   :  { %v588_v60 = vmul.f32 %v1966_v41, %v436_v19  ;;  %v580_v52 = vmul.f32 0.5, %v579_v53  ;;  %v4016_v43 = vsel %vm575_vm0, %v1962_v15, %v572_v33  ;;  %v4632_v19 = vld [vmem:[#allocation28_spill] sm:$0xff] }
 0x469   :  { %1882 = vmatmul.msk.bf16.gmra.mxu1 %vm4625_vm10, %v2021_v8  ;;  %v610_v4 = vmul.f32 %v4016_v43, %v4629_v50  ;;  %vm594_vm10 = vweird.f32 %v1966_v41 }
 0x46a   :  { %1890 = vmatmul.msk.bf16.gmra.mxu3 %vm1889_vm4, %v2021_v8  ;;  %v4626_v8 = vld [vmem:[#allocation20_spill] sm:$0xff]  ;;  %v589_v29 = vmul.f32 %v1966_v41, %v588_v60  ;;  %v581_v32 = vsub.f32 1.5, %v580_v52  ;;  %vm584_vm4 = vweird.f32 %v1964_v22  ;;  %vm595_vm2 = vmor %vm593_vm6, %vm594_vm10 }
 0x46b   :  { %v607_v48 = vmul.f32 %v4000_v47, %v4626_v8  ;;  %vm585_vm14 = vmor %vm583_vm12, %vm584_vm4 }
 0x46c   :  { %v590_v34 = vmul.f32 0.5, %v589_v29  ;;  %v582_v38 = vmul.f32 %v1964_v22, %v581_v32 }
 0x46d   :  { %623 = vxpose.xlu0.b32.cont [11/16] %v607_v48, 128 }
 0x46e   :  { %v591_v49 = vsub.f32 1.5, %v590_v34  ;;  %v4020_v63 = vsel %vm585_vm14, %v1964_v22, %v582_v38 }
 0x46f   :  { %v611_v31 = vmul.f32 %v4020_v63, %v4630_v9 }
 0x470   :  { %v592_v57 = vmul.f32 %v1966_v41, %v591_v49 }
 0x472   :  { %v4024_v61 = vsel %vm595_vm2, %v1966_v41, %v592_v57 }
 0x473   :  { %v612_v39 = vmul.f32 %v4024_v61, %v4631_v0 }
 0x475   :  { %624 = vxpose.xlu0.b32.cont [12/16] %v608_v51, 128 }
 0x47d   :  { %625 = vxpose.xlu0.b32.cont [13/16] %v609_v58, 128 }
 0x485   :  { %626 = vxpose.xlu0.b32.cont [14/16] %v610_v4, 128 }
 0x48d   :  { %627 = vxpose.xlu0.b32.cont [15/16] %v611_v31, 128 }
 0x495   :  { %628 = vxpose.xlu0.b32.end [16/16] %v612_v39, 128 }
 0x4af   :  { %v1429_v21 = vpop.f32.mrf.mxu0 }
 0x4b6   :  { %v1478_v23 = vpop.f32.mrf.mxu1 }
 0x4b7   :  { %v4028_v5 = vadd.f32 %v1478_v23, %v1429_v21  ;;  %v1431_v54 = vpop.f32.mrf.mxu0 }
 0x4b9   :  { %1518 = vxpose.xlu2.b32.start [1/16] %v4028_v5, 128  ;;  %v1449_v4 = vpop.f32.mrf.mxu2 }
 0x4bd   :  { %v1498_v34 = vpop.f32.mrf.mxu3 }
 0x4be   :  { %v1480_v15 = vpop.f32.mrf.mxu1 }
 0x4bf   :  { %v4031_v48 = vadd.f32 %v1480_v15, %v1431_v54  ;;  %v1434_v45 = vpop.f32.mrf.mxu0 }
 0x4c1   :  { %1519 = vxpose.xlu2.b32.cont [2/16] %v4031_v48, 128  ;;  %v629_v44 = vpop.trf.xlu0  ;;  %v1451_v23 = vpop.f32.mrf.mxu2 }
 0x4c2   :  { %v645_v17 = vmul.f32 %v629_v44, %v4632_v19 }
 0x4c4   :  { %661 = vst [vmem:[#allocation2] sm:$0xff] %v645_v17 }
 0x4c5   :  { %v1500_v54 = vpop.f32.mrf.mxu3 }
 0x4c6   :  { %v1483_v20 = vpop.f32.mrf.mxu1  ;;  %v4062_v17 = vadd.f32 %v1500_v54, %v1451_v23 }
 0x4c7   :  { %v4034_v2 = vadd.f32 %v1483_v20, %v1434_v45  ;;  %v1436_v62 = vpop.f32.mrf.mxu0  ;;  %v4058_v45 = vadd.f32 %v1498_v34, %v1449_v4 }
 0x4c9   :  { %1520 = vxpose.xlu2.b32.cont [3/16] %v4034_v2, 128  ;;  %v630_v59 = vpop.trf.xlu0  ;;  %v1454_v44 = vpop.f32.mrf.mxu2 }
 0x4ca   :  { %v646_v12 = vmul.f32 %v630_v59, %v3248_v14 }
 0x4cc   :  { %662 = vst [vmem:[#allocation2 + $0x8] sm:$0xff] %v646_v12 }
 0x4cd   :  { %v1503_v19 = vpop.f32.mrf.mxu3 }
 0x4ce   :  { %v1485_v22 = vpop.f32.mrf.mxu1  ;;  %v4066_v12 = vadd.f32 %v1503_v19, %v1454_v44  ;;  %v4633_v19 = vld [vmem:[#allocation17_spill] sm:$0xff] }
 0x4cf   :  { %v4038_v51 = vadd.f32 %v1485_v22, %v1436_v62  ;;  %v1439_v6 = vpop.f32.mrf.mxu0 }
 0x4d1   :  { %1521 = vxpose.xlu2.b32.cont [4/16] %v4038_v51, 128  ;;  %v631_v41 = vpop.trf.xlu0 }
 0x4d2   :  { %v647_v58 = vmul.f32 %v631_v41, %v3339_v42 }
 0x4d4   :  { %663 = vst [vmem:[#allocation2 + $0x10] sm:$0xff] %v647_v58 }
 0x4d5   :  { %v1505_v59 = vpop.f32.mrf.mxu3 }
 0x4d6   :  { %v1488_v53 = vpop.f32.mrf.mxu1 }
 0x4d7   :  { %v4042_v55 = vadd.f32 %v1488_v53, %v1439_v6  ;;  %v1441_v60 = vpop.f32.mrf.mxu0 }
 0x4d9   :  { %1522 = vxpose.xlu2.b32.cont [5/16] %v4042_v55, 128  ;;  %v632_v29 = vpop.trf.xlu0 }
 0x4da   :  { %v648_v14 = vmul.f32 %v632_v29, %v3416_v36 }
 0x4dc   :  { %664 = vst [vmem:[#allocation2 + $0x18] sm:$0xff] %v648_v14 }
 0x4dd   :  { %v1508_v41 = vpop.f32.mrf.mxu3 }
 0x4de   :  { %v1490_v52 = vpop.f32.mrf.mxu1 }
 0x4df   :  { %v4046_v33 = vadd.f32 %v1490_v52, %v1441_v60  ;;  %v1444_v32 = vpop.f32.mrf.mxu0 }
 0x4e1   :  { %1523 = vxpose.xlu2.b32.cont [6/16] %v4046_v33, 128  ;;  %v633_v42 = vpop.trf.xlu0 }
 0x4e2   :  { %v649_v31 = vmul.f32 %v633_v42, %v3469_v40 }
 0x4e4   :  { %665 = vst [vmem:[#allocation2 + $0x20] sm:$0xff] %v649_v31 }
 0x4e6   :  { %v1493_v38 = vpop.f32.mrf.mxu1 }
 0x4e7   :  { %v4050_v49 = vadd.f32 %v1493_v38, %v1444_v32  ;;  %v1446_v57 = vpop.f32.mrf.mxu0  ;;  %v1510_v32 = vpop.f32.mrf.mxu3 }
 0x4e9   :  { %1524 = vxpose.xlu2.b32.cont [7/16] %v4050_v49, 128  ;;  %v634_v36 = vpop.trf.xlu0 }
 0x4ea   :  { %v650_v15 = vmul.f32 %v634_v36, %v3547_v28  ;;  %v1456_v28 = vpop.f32.mrf.mxu2 }
 0x4eb   :  { %v4070_v58 = vadd.f32 %v1505_v59, %v1456_v28 }
 0x4ec   :  { %666 = vst [vmem:[#allocation2 + $0x28] sm:$0xff] %v650_v15 }
 0x4ee   :  { %v1495_v39 = vpop.f32.mrf.mxu1 }
 0x4ef   :  { %v4054_v21 = vadd.f32 %v1495_v39, %v1446_v57  ;;  %v1513_v42 = vpop.f32.mrf.mxu3 }
 0x4f1   :  { %1525 = vxpose.xlu2.b32.cont [8/16] %v4054_v21, 128  ;;  %v635_v20 = vpop.trf.xlu0 }
 0x4f2   :  { %v651_v40 = vmul.f32 %v635_v20, %v3639_v1  ;;  %v1459_v53 = vpop.f32.mrf.mxu2 }
 0x4f3   :  { %v4074_v52 = vadd.f32 %v1508_v41, %v1459_v53 }
 0x4f4   :  { %667 = vst [vmem:[#allocation2 + $0x30] sm:$0xff] %v651_v40 }
 0x4f7   :  { %v1515_v36 = vpop.f32.mrf.mxu3 }
 0x4f9   :  { %1526 = vxpose.xlu2.b32.cont [9/16] %v4058_v45, 128  ;;  %v636_v62 = vpop.trf.xlu0 }
 0x4fa   :  { %v652_v22 = vmul.f32 %v636_v62, %v3914_v30  ;;  %v1461_v14 = vpop.f32.mrf.mxu2  ;;  %v4634_v62 = vld [vmem:[#allocation15_spill] sm:$0xff] }
 0x4fb   :  { %v4078_v4 = vadd.f32 %v1510_v32, %v1461_v14  ;;  %vm1598_vm7 = vcmp.eq.s32.totalorder %v4634_v62, %v4633_v19  ;;  %v4639_v32 = vld [vmem:[#allocation11_spill] sm:$0xff] }
 0x4fc   :  { %668 = vst [vmem:[#allocation2 + $0x38] sm:$0xff] %v652_v22  ;;  %vm1601_vm0 = vcmp.eq.s32.totalorder %v4639_v32, %v4633_v19 }
 0x501   :  { %1527 = vxpose.xlu2.b32.cont [10/16] %v4062_v17, 128  ;;  %v637_v6 = vpop.trf.xlu0 }
 0x502   :  { %v653_v1 = vmul.f32 %v637_v6, %v3936_v11  ;;  %v4637_v6 = vld [vmem:[#allocation18_spill] sm:$0xff] }
 0x503   :  { %vm1599_vm9 = vcmp.eq.s32.totalorder %v4637_v6, %v4633_v19 }
 0x504   :  { %669 = vst [vmem:[#allocation2 + $0x40] sm:$0xff] %v653_v1 }
 0x509   :  { %1528 = vxpose.xlu2.b32.cont [11/16] %v4066_v12, 128  ;;  %v638_v60 = vpop.trf.xlu0 }
 0x50a   :  { %v654_v30 = vmul.f32 %v638_v60, %v3972_v10  ;;  %v1464_v10 = vpop.f32.mrf.mxu2 }
 0x50b   :  { %v4082_v31 = vadd.f32 %v1513_v42, %v1464_v10 }
 0x50c   :  { %670 = vst [vmem:[#allocation2 + $0x48] sm:$0xff] %v654_v30  ;;  %v4638_v30 = vld [vmem:[#allocation16_spill] sm:$0xff] }
 0x50d   :  { %vm1600_vm13 = vcmp.eq.s32.totalorder %v4638_v30, %v4633_v19 }
 0x511   :  { %1529 = vxpose.xlu2.b32.cont [12/16] %v4070_v58, 128  ;;  %v639_v29 = vpop.trf.xlu0 }
 0x512   :  { %v655_v11 = vmul.f32 %v639_v29, %v4000_v47  ;;  %v1466_v47 = vpop.f32.mrf.mxu2 }
 0x513   :  { %v4086_v23 = vadd.f32 %v1515_v36, %v1466_v47 }
 0x514   :  { %671 = vst [vmem:[#allocation2 + $0x50] sm:$0xff] %v655_v11 }
 0x519   :  { %1530 = vxpose.xlu2.b32.cont [13/16] %v4074_v52, 128  ;;  %v640_v34 = vpop.trf.xlu0 }
 0x51a   :  { %v656_v38 = vmul.f32 %v640_v34, %v4006_v27 }
 0x51c   :  { %672 = vst [vmem:[#allocation2 + $0x58] sm:$0xff] %v656_v38 }
 0x521   :  { %1531 = vxpose.xlu2.b32.cont [14/16] %v4078_v4, 128  ;;  %v641_v57 = vpop.trf.xlu0 }
 0x522   :  { %v657_v39 = vmul.f32 %v641_v57, %v4011_v25 }
 0x524   :  { %673 = vst [vmem:[#allocation2 + $0x60] sm:$0xff] %v657_v39 }
 0x529   :  { %1532 = vxpose.xlu2.b32.cont [15/16] %v4082_v31, 128  ;;  %v642_v54 = vpop.trf.xlu0 }
 0x52a   :  { %v658_v27 = vmul.f32 %v642_v54, %v4016_v43 }
 0x52c   :  { %674 = vst [vmem:[#allocation2 + $0x68] sm:$0xff] %v658_v27 }
 0x531   :  { %1533 = vxpose.xlu2.b32.end [16/16] %v4086_v23, 128  ;;  %v643_v15 = vpop.trf.xlu0 }
 0x532   :  { %v659_v20 = vmul.f32 %v643_v15, %v4020_v63  ;;  %v4635_v63 = vld [vmem:[#allocation14_spill] sm:$0xff] }
 0x534   :  { %675 = vst [vmem:[#allocation2 + $0x70] sm:$0xff] %v659_v20 }
 0x539   :  { %v644_v40 = vpop.trf.xlu0 }
 0x53a   :  { %v660_v25 = vmul.f32 %v644_v40, %v4024_v61  ;;  %v4636_v61 = vmov 0.0  }
 0x53c   :  { %676 = vst [vmem:[#allocation2 + $0x78] sm:$0xff] %v660_v25 }
 0x53d   :  { %1722 = dma.vmem_to_hbm [thread:$0]  %s1715_s14, 2048, %s1717_s12, [#allocation3], %s2023_s15, %s2023_s15, %s2024_s16  }
 0x552   :  { %v1534_v44 = vpop.trf.xlu2 }
 0x553   :  { %v1550_v43 = vadd.f32 %v1534_v44, %v4028_v5 }
 0x555   :  { %v1566_v22 = vadd.f32 %v1550_v43, %v4635_v63 }
 0x557   :  { %vm1582_vm5 = vcmp.gt.f32.partialorder %v1566_v22, 0.0 }
 0x558   :  { %vm1646_vm1 = vmor %vm1582_vm5, %vm1598_vm7 }
 0x559   :  { %v1891_v28 = vsel %vm1646_vm1, 1.0, %v4636_v61 }
 0x55a   :  { %1694 = vst [vmem:[#allocation4] sm:$0xff] %v1891_v28  ;;  %v1535_v59 = vpop.trf.xlu2 }
 0x55b   :  { %v1551_v5 = vadd.f32 %v1535_v59, %v4031_v48 }
 0x55d   :  { %v1567_v1 = vadd.f32 %v1551_v5, %v2651_v26 }
 0x55f   :  { %vm1583_vm3 = vcmp.gt.f32.partialorder %v1567_v1, 0.0 }
 0x560   :  { %vm1647_vm11 = vmor %vm1583_vm3, %vm1599_vm9 }
 0x561   :  { %v1892_v53 = vsel %vm1647_vm11, 1.0, %v4636_v61 }
 0x562   :  { %1695 = vst [vmem:[#allocation4 + $0x8] sm:$0xff] %v1892_v53  ;;  %v1536_v41 = vpop.trf.xlu2 }
 0x563   :  { %v1552_v60 = vadd.f32 %v1536_v41, %v4034_v2 }
 0x565   :  { %v1568_v29 = vadd.f32 %v1552_v60, %v2656_v16 }
 0x567   :  { %vm1584_vm8 = vcmp.gt.f32.partialorder %v1568_v29, 0.0 }
 0x568   :  { %vm1648_vm15 = vmor %vm1584_vm8, %vm1600_vm13 }
 0x569   :  { %v1893_v48 = vsel %vm1648_vm15, 1.0, %v4636_v61 }
 0x56a   :  { %1696 = vst [vmem:[#allocation4 + $0x10] sm:$0xff] %v1893_v48  ;;  %v1537_v14 = vpop.trf.xlu2 }
 0x56b   :  { %v1553_v26 = vadd.f32 %v1537_v14, %v4038_v51 }
 0x56d   :  { %v1569_v11 = vadd.f32 %v1553_v26, %v2661_v46 }
 0x56f   :  { %vm1585_vm4 = vcmp.gt.f32.partialorder %v1569_v11, 0.0 }
 0x570   :  { %vm1649_vm12 = vmor %vm1585_vm4, %vm1601_vm0 }
 0x571   :  { %v1894_v2 = vsel %vm1649_vm12, 1.0, %v4636_v61 }
 0x572   :  { %1697 = vst [vmem:[#allocation4 + $0x18] sm:$0xff] %v1894_v2  ;;  %v1538_v34 = vpop.trf.xlu2 }
 0x573   :  { %v1554_v16 = vadd.f32 %v1538_v34, %v4042_v55 }
 0x575   :  { %v1570_v38 = vadd.f32 %v1554_v16, %v2668_v24 }
 0x577   :  { %vm1586_vm14 = vcmp.gt.f32.partialorder %v1570_v38, 0.0 }
 0x578   :  { %v1895_v10 = vsel %vm1586_vm14, 1.0, %v4636_v61 }
 0x579   :  { %1698 = vst [vmem:[#allocation4 + $0x20] sm:$0xff] %v1895_v10 }
 0x57a   :  { %v1539_v51 = vpop.trf.xlu2 }
 0x57b   :  { %v1555_v42 = vadd.f32 %v1539_v51, %v4046_v33 }
 0x57d   :  { %v1571_v57 = vadd.f32 %v1555_v42, %v2675_v56 }
 0x57f   :  { %vm1587_vm10 = vcmp.gt.f32.partialorder %v1571_v57, 0.0 }
 0x580   :  { %v1896_v46 = vsel %vm1587_vm10, 1.0, %v4636_v61 }
 0x581   :  { %1699 = vst [vmem:[#allocation4 + $0x28] sm:$0xff] %v1896_v46 }
 0x582   :  { %v1540_v39 = vpop.trf.xlu2 }
 0x583   :  { %v1556_v47 = vadd.f32 %v1540_v39, %v4050_v49 }
 0x585   :  { %v1572_v55 = vadd.f32 %v1556_v47, %v2680_v35 }
 0x587   :  { %vm1588_vm6 = vcmp.gt.f32.partialorder %v1572_v55, 0.0 }
 0x588   :  { %v1897_v24 = vsel %vm1588_vm6, 1.0, %v4636_v61 }
 0x589   :  { %1700 = vst [vmem:[#allocation4 + $0x30] sm:$0xff] %v1897_v24 }
 0x58a   :  { %v1541_v36 = vpop.trf.xlu2 }
 0x58b   :  { %v1557_v54 = vadd.f32 %v1541_v36, %v4054_v21 }
 0x58d   :  { %v1573_v33 = vadd.f32 %v1557_v54, %v4599_v13 }
 0x58f   :  { %vm1589_vm2 = vcmp.gt.f32.partialorder %v1573_v33, 0.0 }
 0x590   :  { %v1898_v56 = vsel %vm1589_vm2, 1.0, %v4636_v61 }
 0x591   :  { %1701 = vst [vmem:[#allocation4 + $0x38] sm:$0xff] %v1898_v56 }
 0x592   :  { %v1542_v27 = vpop.trf.xlu2 }
 0x593   :  { %v1558_v15 = vadd.f32 %v1542_v27, %v4058_v45 }
 0x595   :  { %v1574_v49 = vadd.f32 %v1558_v15, %v4607_v37 }
 0x597   :  { %vm1590_vm7 = vcmp.gt.f32.partialorder %v1574_v49, 0.0 }
 0x598   :  { %v1899_v35 = vsel %vm1590_vm7, 1.0, %v4636_v61 }
 0x599   :  { %1702 = vst [vmem:[#allocation4 + $0x40] sm:$0xff] %v1899_v35 }
 0x59a   :  { %v1543_v20 = vpop.trf.xlu2 }
 0x59b   :  { %v1559_v40 = vadd.f32 %v1543_v20, %v4062_v17 }
 0x59d   :  { %v1575_v21 = vadd.f32 %v1559_v40, %v4622_v7 }
 0x59f   :  { %vm1591_vm5 = vcmp.gt.f32.partialorder %v1575_v21, 0.0 }
 0x5a0   :  { %v1900_v13 = vsel %vm1591_vm5, 1.0, %v4636_v61 }
 0x5a1   :  { %1703 = vst [vmem:[#allocation4 + $0x48] sm:$0xff] %v1900_v13 }
 0x5a2   :  { %v1544_v25 = vpop.trf.xlu2 }
 0x5a3   :  { %v1560_v44 = vadd.f32 %v1544_v25, %v4066_v12 }
 0x5a5   :  { %v1576_v45 = vadd.f32 %v1560_v44, %v4626_v8 }
 0x5a7   :  { %vm1592_vm1 = vcmp.gt.f32.partialorder %v1576_v45, 0.0 }
 0x5a8   :  { %v1901_v37 = vsel %vm1592_vm1, 1.0, %v4636_v61 }
 0x5a9   :  { %1704 = vst [vmem:[#allocation4 + $0x50] sm:$0xff] %v1901_v37 }
 0x5aa   :  { %v1545_v43 = vpop.trf.xlu2 }
 0x5ab   :  { %v1561_v19 = vadd.f32 %v1545_v43, %v4070_v58 }
 0x5ad   :  { %v1577_v17 = vadd.f32 %v1561_v19, %v4627_v18 }
 0x5af   :  { %vm1593_vm9 = vcmp.gt.f32.partialorder %v1577_v17, 0.0 }
 0x5b0   :  { %v1902_v7 = vsel %vm1593_vm9, 1.0, %v4636_v61 }
 0x5b1   :  { %1705 = vst [vmem:[#allocation4 + $0x58] sm:$0xff] %v1902_v7 }
 0x5b2   :  { %v1546_v62 = vpop.trf.xlu2 }
 0x5b3   :  { %v1562_v63 = vadd.f32 %v1546_v62, %v4074_v52 }
 0x5b5   :  { %v1578_v12 = vadd.f32 %v1562_v63, %v4628_v3 }
 0x5b7   :  { %vm1594_vm3 = vcmp.gt.f32.partialorder %v1578_v12, 0.0 }
 0x5b8   :  { %v1903_v8 = vsel %vm1594_vm3, 1.0, %v4636_v61 }
 0x5b9   :  { %1706 = vst [vmem:[#allocation4 + $0x60] sm:$0xff] %v1903_v8 }
 0x5ba   :  { %v1547_v22 = vpop.trf.xlu2 }
 0x5bb   :  { %v1563_v28 = vadd.f32 %v1547_v22, %v4078_v4 }
 0x5bd   :  { %v1579_v58 = vadd.f32 %v1563_v28, %v4629_v50 }
 0x5bf   :  { %vm1595_vm11 = vcmp.gt.f32.partialorder %v1579_v58, 0.0 }
 0x5c0   :  { %v1904_v18 = vsel %vm1595_vm11, 1.0, %v4636_v61 }
 0x5c1   :  { %1707 = vst [vmem:[#allocation4 + $0x68] sm:$0xff] %v1904_v18 }
 0x5c2   :  { %v1548_v59 = vpop.trf.xlu2 }
 0x5c3   :  { %v1564_v5 = vadd.f32 %v1548_v59, %v4082_v31 }
 0x5c5   :  { %v1580_v52 = vadd.f32 %v1564_v5, %v4630_v9 }
 0x5c7   :  { %vm1596_vm13 = vcmp.gt.f32.partialorder %v1580_v52, 0.0 }
 0x5c8   :  { %v1905_v3 = vsel %vm1596_vm13, 1.0, %v4636_v61 }
 0x5c9   :  { %1708 = vst [vmem:[#allocation4 + $0x70] sm:$0xff] %v1905_v3 }
 0x5ca   :  { %v1549_v6 = vpop.trf.xlu2 }
 0x5cb   :  { %v1565_v1 = vadd.f32 %v1549_v6, %v4086_v23 }
 0x5cd   :  { %v1581_v50 = vadd.f32 %v1565_v1, %v4631_v0 }
 0x5cf   :  { %vm1597_vm8 = vcmp.gt.f32.partialorder %v1581_v50, 0.0 }
 0x5d0   :  { %v1906_v9 = vsel %vm1597_vm8, 1.0, %v4636_v61 }
 0x5d1   :  { %1709 = vst [vmem:[#allocation4 + $0x78] sm:$0xff] %v1906_v9 }
 0x5d2   :  { %1735 = dma.vmem_to_hbm [thread:$0]  %s1728_s17, 2048, %s1730_s20, [#allocation5], %s2023_s15, %s2023_s15, %s2024_s16  }
 0x5d3   :  { %2015 = dma.done.wait [#allocation3], 2048  }
 0x5d4   :  { %2016 = vsyncadd [#allocation3], 4294965248 }
 0x5d5   :  { %2017 = dma.done.wait [#allocation5], 2048  }
 0x5d6   :  { %2018 = vsyncadd [#allocation5], 4294965248 }
 0x5d7   :  { %1744 = vsyncpa [#allocation3], 1 }
 0x5d8   :  { %1745 = vsyncpa [#allocation5], 1 }

</bundles_post_ra>
